<compile_context>
chip_gen: v7x
topology: tpu7x:2x2x1
jax: 0.10.0
libtpu: 0.0.40
codegen_flags: <defaults>
</compile_context>

<pallas_src>
import functools

import jax
import jax.numpy as jnp
from jax import lax
from jax.experimental import pallas as pl
from jax.experimental.pallas import tpu as pltpu

VMEM = pl.BlockSpec(memory_space=pltpu.MemorySpace.VMEM)

# Model constants (PyTorch module with frame_stack_len=3, 16x16 input).
C_IN, H, W = 3, 16, 16
C1, K1 = 6, 3          # conv_1: 3 -> 6, 3x3
C2, K2 = 12, 2         # conv_2: 6 -> 12, 2x2
H1 = H - K1 + 1        # 14  (conv1 out)
P1 = H1 - 1            # 13  (pool1 out)
H2 = P1 - K2 + 1       # 12  (conv2 out)
P2 = H2 - 1            # 11  (pool2 out)
FLAT = C2 * P2 * P2    # 1452
HID = 128
N_ACT = 3
N_HEAD = 2 * N_ACT + 1  # mean(3) | cov(3) | value(1)
HEAD_PAD = 8            # fused head output padded to [B, 8]


# ------------------------------ fused kernel ------------------------------- #

def _policy_kernel(x_ref, w1_ref, b1_ref, w2_ref, b2_ref,
                   wl_ref, bl_ref, wh_ref, bh_ref,
                   out_ref, xl_ref, *, batch):
    hw = H * W
    L = batch * hw

    def shift_left(a, s):
        # out[:, p] = a[:, (p + s) % L]; wrapped values only land in junk columns.
        return pltpu.roll(a, L - s, axis=1) if s else a

    # Input relayout [B, C_IN, HW] -> channel-major slab [C_IN, B*HW]
    # (256-lane-aligned concat; avoids a wrapper-side transpose dispatch).
    if batch > 1:
        x = jnp.concatenate([x_ref[b] for b in range(batch)], axis=1)
    else:
        x = x_ref[0]

    def conv_relu(a, w_ref, b_ref, k):
        # All k*k taps stacked along K -> ONE MXU dot.  Shifts are composed:
        # k-1 rolls for the dy stack, k-1 rolls of the stacked block for dx.
        t = jnp.concatenate([shift_left(a, dy * W) for dy in range(k)], axis=0)
        r = jnp.concatenate([shift_left(t, dx) for dx in range(k)], axis=0)
        acc = jnp.dot(w_ref[...], r, preferred_element_type=jnp.float32)
        return jnp.maximum(acc + b_ref[...], 0.0)

    def pool_2x2_s1(a):
        # Separable 2x2 stride-1 max-pool: 2 rolls + 2 maxes.
        m = jnp.maximum(a, shift_left(a, 1))
        return jnp.maximum(m, shift_left(m, W))

    a = pool_2x2_s1(conv_relu(x, w1_ref, b1_ref, K1))   # [C1, L], valid 13x13
    a = pool_2x2_s1(conv_relu(a, w2_ref, b2_ref, K2))   # [C2, L], valid 11x11

    # lin_1: relayout [C2, B*hw] -> [B, C2*hw] via 256-lane-aligned scratch
    # stores, then ONE [B, 3072] @ [3072, 128] dot.  lin1_w is zero outside
    # each channel's valid 11x11 window, so junk grid columns contribute 0.
    for b in range(batch):
        for c in range(C2):
            xl_ref[b:b + 1, c * hw:(c + 1) * hw] = a[c:c + 1, b * hw:(b + 1) * hw]
    h = jnp.dot(xl_ref[...], wl_ref[...], preferred_element_type=jnp.float32)
    h = jnp.maximum(h + bl_ref[...], 0.0)               # [B, 128]

    # Fused heads: one [B, 128] @ [128, 8] dot, per-column epilogue via select.
    y = jnp.dot(h, wh_ref[...], preferred_element_type=jnp.float32) + bh_ref[...]
    col = lax.broadcasted_iota(jnp.int32, y.shape, 1)
    sig = 1.0 / (1.0 + jnp.exp(-y))                                     # sigmoid
    sp = jnp.maximum(y, 0.0) + jnp.log(1.0 + jnp.exp(-jnp.abs(y)))      # stable softplus
    out_ref[...] = jnp.where(col < N_ACT, sig,
                             jnp.where(col < 2 * N_ACT, sp, y))


def policy_forward(params, x):
    """x: [B, 3, 16, 16] float32 (NCHW, like the PyTorch module)."""
    batch = x.shape[0]
    x3 = x.reshape(batch, C_IN, H * W)          # free reshape, no transpose dispatch
    kernel = functools.partial(_policy_kernel, batch=batch)
    out = pl.pallas_call(
        kernel,
        out_shape=jax.ShapeDtypeStruct((batch, HEAD_PAD), jnp.float32),
        in_specs=[VMEM] * 9,
        out_specs=VMEM,
        scratch_shapes=[pltpu.VMEM((batch, C2 * H * W), jnp.float32)],
    )(x3, params["conv1_w"], params["conv1_b"],
      params["conv2_w"], params["conv2_b"],
      params["lin1_w"], params["lin1_b"],
      params["head_w"], params["head_b"])
    mean = out[:, 0:N_ACT]
    cov = out[:, N_ACT:2 * N_ACT]
    v = out[:, 2 * N_ACT:N_HEAD]
    return mean, cov, v


# --------------------------- parameter handling ----------------------------- #

def init_params(key):
    """Raw parameters in PyTorch-like layouts."""
    def uniform(k, shape, fan_in):
        bound = 1.0 / float(fan_in) ** 0.5
        return jax.random.uniform(k, shape, jnp.float32, -bound, bound)

    ks = jax.random.split(key, 12)
    p = {}
    p["conv1_w"] = uniform(ks[0], (C1, C_IN, K1, K1), C_IN * K1 * K1)
    p["conv1_b"] = uniform(ks[1], (C1,), C_IN * K1 * K1)
    p["conv2_w"] = uniform(ks[2], (C2, C1, K2, K2), C1 * K2 * K2)
    p["conv2_b"] = uniform(ks[3], (C2,), C1 * K2 * K2)
    p["lin1_w"] = uniform(ks[4], (FLAT, HID), FLAT)      # stored as [in, out]
    p["lin1_b"] = uniform(ks[5], (HID,), FLAT)
    p["lin2m_w"] = uniform(ks[6], (HID, N_ACT), HID)
    p["lin2m_b"] = uniform(ks[7], (N_ACT,), HID)
    p["lin2c_w"] = uniform(ks[8], (HID, N_ACT), HID)
    p["lin2c_b"] = uniform(ks[9], (N_ACT,), HID)
    p["lin2v_w"] = uniform(ks[10], (HID, 1), HID)
    p["lin2v_b"] = uniform(ks[11], (1,), HID)
    return p


def prepare_params(raw):
    """One-time conversion to kernel-ready layouts (no per-forward transposes)."""
    p = {}
    # conv weights -> [C_out, kw*kh*C_in] matching the tap-stacked RHS order
    # (dx outer, dy middle, c_in inner).
    p["conv1_w"] = jnp.transpose(raw["conv1_w"], (0, 3, 2, 1)).reshape(C1, K1 * K1 * C_IN)
    p["conv1_b"] = raw["conv1_b"].reshape(C1, 1)
    p["conv2_w"] = jnp.transpose(raw["conv2_w"], (0, 3, 2, 1)).reshape(C2, K2 * K2 * C1)
    p["conv2_b"] = raw["conv2_b"].reshape(C2, 1)
    # lin_1 -> single [C2*H*W, HID] matrix, zero outside each channel's 11x11 window.
    wl = raw["lin1_w"].reshape(C2, P2, P2, HID)
    wl = jnp.zeros((C2, H, W, HID), jnp.float32).at[:, :P2, :P2, :].set(wl)
    p["lin1_w"] = wl.reshape(C2 * H * W, HID)
    p["lin1_b"] = raw["lin1_b"].reshape(1, HID)
    # fused heads: mean | cov | value | zero-pad to 8 columns.
    head_w = jnp.concatenate([raw["lin2m_w"], raw["lin2c_w"], raw["lin2v_w"]], axis=1)
    head_b = jnp.concatenate([raw["lin2m_b"], raw["lin2c_b"], raw["lin2v_b"]])
    p["head_w"] = jnp.concatenate(
        [head_w, jnp.zeros((HID, HEAD_PAD - N_HEAD), jnp.float32)], axis=1)
    p["head_b"] = jnp.concatenate(
        [head_b, jnp.zeros((HEAD_PAD - N_HEAD,), jnp.float32)]).reshape(1, HEAD_PAD)
    return p


# ------------------------- pure-JAX reference model ------------------------- #

def policy_forward_ref(raw, x):
    hp = lax.Precision.HIGHEST

    def conv_relu(a, w, b):
        co, _, kh, kw = w.shape
        Ho, Wo = a.shape[2] - kh + 1, a.shape[3] - kw + 1
        acc = jnp.zeros((a.shape[0], co, Ho, Wo), jnp.float32)
        for dy in range(kh):
            for dx in range(kw):
                acc = acc + jnp.einsum("oc,bcyx->boyx", w[:, :, dy, dx],
                                       a[:, :, dy:dy + Ho, dx:dx + Wo], precision=hp)
        return jnp.maximum(acc + b[None, :, None, None], 0.0)

    def pool(a):
        return jnp.maximum(jnp.maximum(a[:, :, :-1, :-1], a[:, :, :-1, 1:]),
                           jnp.maximum(a[:, :, 1:, :-1], a[:, :, 1:, 1:]))

    a = pool(conv_relu(x, raw["conv1_w"], raw["conv1_b"]))
    a = pool(conv_relu(a, raw["conv2_w"], raw["conv2_b"]))
    flat = a.reshape(x.shape[0], -1)
    h = jnp.maximum(jnp.dot(flat, raw["lin1_w"], precision=hp) + raw["lin1_b"], 0.0)
    m = jnp.dot(h, raw["lin2m_w"], precision=hp) + raw["lin2m_b"]
    c = jnp.dot(h, raw["lin2c_w"], precision=hp) + raw["lin2c_b"]
    v = jnp.dot(h, raw["lin2v_w"], precision=hp) + raw["lin2v_b"]
    mean = 1.0 / (1.0 + jnp.exp(-m))
    cov = jnp.maximum(c, 0.0) + jnp.log(1.0 + jnp.exp(-jnp.abs(c)))
    return mean, cov, v


# ----------------------------------- main ----------------------------------- #

if __name__ == "__main__":
    key = jax.random.PRNGKey(0)
    pkey, xkey = jax.random.split(key)
    raw = init_params(pkey)
    params = prepare_params(raw)
    x = jax.random.normal(xkey, (2, C_IN, H, W), dtype=jnp.float32)

    fwd = jax.jit(policy_forward)
    mean, cov, v = fwd(params, x)
    jax.block_until_ready((mean, cov, v))

    mean_r, cov_r, v_r = policy_forward_ref(raw, x)

    assert mean.shape == (2, N_ACT) and cov.shape == (2, N_ACT) and v.shape == (2, 1)
    assert mean.dtype == jnp.float32
    assert bool(jnp.all(jnp.isfinite(mean))) and bool(jnp.all(cov > 0.0))
    assert bool(jnp.all(jnp.isfinite(v)))
    assert bool(jnp.allclose(mean, mean_r, rtol=2e-3, atol=2e-3))
    assert bool(jnp.allclose(cov, cov_r, rtol=2e-3, atol=2e-3))
    assert bool(jnp.allclose(v, v_r, rtol=2e-3, atol=2e-3))
    print("KERNEL_OK")
</pallas_src>

<mosaic_0001>
module attributes {stable_mosaic.version = 11 : i64} {
  func.func @_policy_kernel(%arg0: memref<2x3x256xf32, #tpu.memory_space<vmem>>, %arg1: memref<6x27xf32, #tpu.memory_space<vmem>>, %arg2: memref<6x1xf32, #tpu.memory_space<vmem>>, %arg3: memref<12x24xf32, #tpu.memory_space<vmem>>, %arg4: memref<12x1xf32, #tpu.memory_space<vmem>>, %arg5: memref<3072x128xf32, #tpu.memory_space<vmem>>, %arg6: memref<1x128xf32, #tpu.memory_space<vmem>>, %arg7: memref<128x8xf32, #tpu.memory_space<vmem>>, %arg8: memref<1x8xf32, #tpu.memory_space<vmem>>, %arg9: memref<2x8xf32, #tpu.memory_space<vmem>>, %arg10: memref<2x3072xf32, #tpu.memory_space<vmem>>) attributes {dimension_semantics = [], scalar_prefetch = 0 : i64, scratch_operands = 1 : i64, tpu.core_type = #tpu.core_type<tc>} {
    %c0 = arith.constant 0 : index
    %c0_0 = arith.constant 0 : index
    %c0_1 = arith.constant 0 : index
    %0 = vector.load %arg0[%c0, %c0_0, %c0_1] : memref<2x3x256xf32, #tpu.memory_space<vmem>>, vector<1x3x256xf32>
    %1 = vector.shape_cast %0 : vector<1x3x256xf32> to vector<3x256xf32>
    %c1 = arith.constant 1 : index
    %c0_2 = arith.constant 0 : index
    %c0_3 = arith.constant 0 : index
    %2 = vector.load %arg0[%c1, %c0_2, %c0_3] : memref<2x3x256xf32, #tpu.memory_space<vmem>>, vector<1x3x256xf32>
    %3 = vector.shape_cast %2 : vector<1x3x256xf32> to vector<3x256xf32>
    %4 = tpu.concatenate %1, %3 in 1 : vector<3x256xf32>, vector<3x256xf32> -> vector<3x512xf32>
    %c496_i32 = arith.constant 496 : i32
    %5 = tpu.dynamic_rotate %4 by %c496_i32 dim 1 : vector<3x512xf32>, i32 -> vector<3x512xf32>
    %c480_i32 = arith.constant 480 : i32
    %6 = tpu.dynamic_rotate %4 by %c480_i32 dim 1 : vector<3x512xf32>, i32 -> vector<3x512xf32>
    %7 = tpu.concatenate %4, %5, %6 in 0 : vector<3x512xf32>, vector<3x512xf32>, vector<3x512xf32> -> vector<9x512xf32>
    %c511_i32 = arith.constant 511 : i32
    %8 = tpu.dynamic_rotate %7 by %c511_i32 dim 1 : vector<9x512xf32>, i32 -> vector<9x512xf32>
    %c510_i32 = arith.constant 510 : i32
    %9 = tpu.dynamic_rotate %7 by %c510_i32 dim 1 : vector<9x512xf32>, i32 -> vector<9x512xf32>
    %10 = tpu.concatenate %7, %8, %9 in 0 : vector<9x512xf32>, vector<9x512xf32>, vector<9x512xf32> -> vector<27x512xf32>
    %c0_4 = arith.constant 0 : index
    %c0_5 = arith.constant 0 : index
    %11 = vector.load %arg1[%c0_4, %c0_5] : memref<6x27xf32, #tpu.memory_space<vmem>>, vector<6x27xf32>
    %cst = arith.constant dense<0.000000e+00> : vector<6x512xf32>
    %12 = tpu.matmul %11, %10, %cst {dimension_numbers = #tpu.dot_dimension_numbers<[1], [0], [0], [1], [0, 0, 1, 1], [], []>} : vector<6x27xf32>, vector<27x512xf32>, vector<6x512xf32> -> vector<6x512xf32>
    %c0_6 = arith.constant 0 : index
    %c0_7 = arith.constant 0 : index
    %13 = vector.load %arg2[%c0_6, %c0_7] : memref<6x1xf32, #tpu.memory_space<vmem>>, vector<6x1xf32>
    %14 = vector.broadcast %13 : vector<6x1xf32> to vector<6x512xf32>
    %15 = arith.addf %12, %14 : vector<6x512xf32>
    %cst_8 = arith.constant 0.000000e+00 : f32
    %16 = vector.broadcast %cst_8 : f32 to vector<6x512xf32>
    %17 = arith.maximumf %15, %16 : vector<6x512xf32>
    %c511_i32_9 = arith.constant 511 : i32
    %18 = tpu.dynamic_rotate %17 by %c511_i32_9 dim 1 : vector<6x512xf32>, i32 -> vector<6x512xf32>
    %19 = arith.maximumf %17, %18 : vector<6x512xf32>
    %c496_i32_10 = arith.constant 496 : i32
    %20 = tpu.dynamic_rotate %19 by %c496_i32_10 dim 1 : vector<6x512xf32>, i32 -> vector<6x512xf32>
    %21 = arith.maximumf %19, %20 : vector<6x512xf32>
    %c496_i32_11 = arith.constant 496 : i32
    %22 = tpu.dynamic_rotate %21 by %c496_i32_11 dim 1 : vector<6x512xf32>, i32 -> vector<6x512xf32>
    %23 = tpu.concatenate %21, %22 in 0 : vector<6x512xf32>, vector<6x512xf32> -> vector<12x512xf32>
    %c511_i32_12 = arith.constant 511 : i32
    %24 = tpu.dynamic_rotate %23 by %c511_i32_12 dim 1 : vector<12x512xf32>, i32 -> vector<12x512xf32>
    %25 = tpu.concatenate %23, %24 in 0 : vector<12x512xf32>, vector<12x512xf32> -> vector<24x512xf32>
    %c0_13 = arith.constant 0 : index
    %c0_14 = arith.constant 0 : index
    %26 = vector.load %arg3[%c0_13, %c0_14] : memref<12x24xf32, #tpu.memory_space<vmem>>, vector<12x24xf32>
    %cst_15 = arith.constant dense<0.000000e+00> : vector<12x512xf32>
    %27 = tpu.matmul %26, %25, %cst_15 {dimension_numbers = #tpu.dot_dimension_numbers<[1], [0], [0], [1], [0, 0, 1, 1], [], []>} : vector<12x24xf32>, vector<24x512xf32>, vector<12x512xf32> -> vector<12x512xf32>
    %c0_16 = arith.constant 0 : index
    %c0_17 = arith.constant 0 : index
    %28 = vector.load %arg4[%c0_16, %c0_17] : memref<12x1xf32, #tpu.memory_space<vmem>>, vector<12x1xf32>
    %29 = vector.broadcast %28 : vector<12x1xf32> to vector<12x512xf32>
    %30 = arith.addf %27, %29 : vector<12x512xf32>
    %cst_18 = arith.constant 0.000000e+00 : f32
    %31 = vector.broadcast %cst_18 : f32 to vector<12x512xf32>
    %32 = arith.maximumf %30, %31 : vector<12x512xf32>
    %c511_i32_19 = arith.constant 511 : i32
    %33 = tpu.dynamic_rotate %32 by %c511_i32_19 dim 1 : vector<12x512xf32>, i32 -> vector<12x512xf32>
    %34 = arith.maximumf %32, %33 : vector<12x512xf32>
    %c496_i32_20 = arith.constant 496 : i32
    %35 = tpu.dynamic_rotate %34 by %c496_i32_20 dim 1 : vector<12x512xf32>, i32 -> vector<12x512xf32>
    %36 = arith.maximumf %34, %35 : vector<12x512xf32>
    %37 = vector.extract_strided_slice %36 {offsets = [0, 0], sizes = [1, 256], strides = [1, 1]} : vector<12x512xf32> to vector<1x256xf32>
    %c0_21 = arith.constant 0 : index
    %c0_22 = arith.constant 0 : index
    %38 = vector.load %arg10[%c0_21, %c0_22] : memref<2x3072xf32, #tpu.memory_space<vmem>>, vector<1x256xf32>
    tpu.vector_store %arg10[%c0_21, %c0_22], %37 {strides = array<i32>} : memref<2x3072xf32, #tpu.memory_space<vmem>>, vector<1x256xf32>,
    %39 = vector.extract_strided_slice %36 {offsets = [1, 0], sizes = [1, 256], strides = [1, 1]} : vector<12x512xf32> to vector<1x256xf32>
    %c0_23 = arith.constant 0 : index
    %c256 = arith.constant 256 : index
    %40 = vector.load %arg10[%c0_23, %c256] : memref<2x3072xf32, #tpu.memory_space<vmem>>, vector<1x256xf32>
    tpu.vector_store %arg10[%c0_23, %c256], %39 {strides = array<i32>} : memref<2x3072xf32, #tpu.memory_space<vmem>>, vector<1x256xf32>,
    %41 = vector.extract_strided_slice %36 {offsets = [2, 0], sizes = [1, 256], strides = [1, 1]} : vector<12x512xf32> to vector<1x256xf32>
    %c0_24 = arith.constant 0 : index
    %c512 = arith.constant 512 : index
    %42 = vector.load %arg10[%c0_24, %c512] : memref<2x3072xf32, #tpu.memory_space<vmem>>, vector<1x256xf32>
    tpu.vector_store %arg10[%c0_24, %c512], %41 {strides = array<i32>} : memref<2x3072xf32, #tpu.memory_space<vmem>>, vector<1x256xf32>,
    %43 = vector.extract_strided_slice %36 {offsets = [3, 0], sizes = [1, 256], strides = [1, 1]} : vector<12x512xf32> to vector<1x256xf32>
    %c0_25 = arith.constant 0 : index
    %c768 = arith.constant 768 : index
    %44 = vector.load %arg10[%c0_25, %c768] : memref<2x3072xf32, #tpu.memory_space<vmem>>, vector<1x256xf32>
    tpu.vector_store %arg10[%c0_25, %c768], %43 {strides = array<i32>} : memref<2x3072xf32, #tpu.memory_space<vmem>>, vector<1x256xf32>,
    %45 = vector.extract_strided_slice %36 {offsets = [4, 0], sizes = [1, 256], strides = [1, 1]} : vector<12x512xf32> to vector<1x256xf32>
    %c0_26 = arith.constant 0 : index
    %c1024 = arith.constant 1024 : index
    %46 = vector.load %arg10[%c0_26, %c1024] : memref<2x3072xf32, #tpu.memory_space<vmem>>, vector<1x256xf32>
    tpu.vector_store %arg10[%c0_26, %c1024], %45 {strides = array<i32>} : memref<2x3072xf32, #tpu.memory_space<vmem>>, vector<1x256xf32>,
    %47 = vector.extract_strided_slice %36 {offsets = [5, 0], sizes = [1, 256], strides = [1, 1]} : vector<12x512xf32> to vector<1x256xf32>
    %c0_27 = arith.constant 0 : index
    %c1280 = arith.constant 1280 : index
    %48 = vector.load %arg10[%c0_27, %c1280] : memref<2x3072xf32, #tpu.memory_space<vmem>>, vector<1x256xf32>
    tpu.vector_store %arg10[%c0_27, %c1280], %47 {strides = array<i32>} : memref<2x3072xf32, #tpu.memory_space<vmem>>, vector<1x256xf32>,
    %49 = vector.extract_strided_slice %36 {offsets = [6, 0], sizes = [1, 256], strides = [1, 1]} : vector<12x512xf32> to vector<1x256xf32>
    %c0_28 = arith.constant 0 : index
    %c1536 = arith.constant 1536 : index
    %50 = vector.load %arg10[%c0_28, %c1536] : memref<2x3072xf32, #tpu.memory_space<vmem>>, vector<1x256xf32>
    tpu.vector_store %arg10[%c0_28, %c1536], %49 {strides = array<i32>} : memref<2x3072xf32, #tpu.memory_space<vmem>>, vector<1x256xf32>,
    %51 = vector.extract_strided_slice %36 {offsets = [7, 0], sizes = [1, 256], strides = [1, 1]} : vector<12x512xf32> to vector<1x256xf32>
    %c0_29 = arith.constant 0 : index
    %c1792 = arith.constant 1792 : index
    %52 = vector.load %arg10[%c0_29, %c1792] : memref<2x3072xf32, #tpu.memory_space<vmem>>, vector<1x256xf32>
    tpu.vector_store %arg10[%c0_29, %c1792], %51 {strides = array<i32>} : memref<2x3072xf32, #tpu.memory_space<vmem>>, vector<1x256xf32>,
    %53 = vector.extract_strided_slice %36 {offsets = [8, 0], sizes = [1, 256], strides = [1, 1]} : vector<12x512xf32> to vector<1x256xf32>
    %c0_30 = arith.constant 0 : index
    %c2048 = arith.constant 2048 : index
    %54 = vector.load %arg10[%c0_30, %c2048] : memref<2x3072xf32, #tpu.memory_space<vmem>>, vector<1x256xf32>
    tpu.vector_store %arg10[%c0_30, %c2048], %53 {strides = array<i32>} : memref<2x3072xf32, #tpu.memory_space<vmem>>, vector<1x256xf32>,
    %55 = vector.extract_strided_slice %36 {offsets = [9, 0], sizes = [1, 256], strides = [1, 1]} : vector<12x512xf32> to vector<1x256xf32>
    %c0_31 = arith.constant 0 : index
    %c2304 = arith.constant 2304 : index
    %56 = vector.load %arg10[%c0_31, %c2304] : memref<2x3072xf32, #tpu.memory_space<vmem>>, vector<1x256xf32>
    tpu.vector_store %arg10[%c0_31, %c2304], %55 {strides = array<i32>} : memref<2x3072xf32, #tpu.memory_space<vmem>>, vector<1x256xf32>,
    %57 = vector.extract_strided_slice %36 {offsets = [10, 0], sizes = [1, 256], strides = [1, 1]} : vector<12x512xf32> to vector<1x256xf32>
    %c0_32 = arith.constant 0 : index
    %c2560 = arith.constant 2560 : index
    %58 = vector.load %arg10[%c0_32, %c2560] : memref<2x3072xf32, #tpu.memory_space<vmem>>, vector<1x256xf32>
    tpu.vector_store %arg10[%c0_32, %c2560], %57 {strides = array<i32>} : memref<2x3072xf32, #tpu.memory_space<vmem>>, vector<1x256xf32>,
    %59 = vector.extract_strided_slice %36 {offsets = [11, 0], sizes = [1, 256], strides = [1, 1]} : vector<12x512xf32> to vector<1x256xf32>
    %c0_33 = arith.constant 0 : index
    %c2816 = arith.constant 2816 : index
    %60 = vector.load %arg10[%c0_33, %c2816] : memref<2x3072xf32, #tpu.memory_space<vmem>>, vector<1x256xf32>
    tpu.vector_store %arg10[%c0_33, %c2816], %59 {strides = array<i32>} : memref<2x3072xf32, #tpu.memory_space<vmem>>, vector<1x256xf32>,
    %61 = vector.extract_strided_slice %36 {offsets = [0, 256], sizes = [1, 256], strides = [1, 1]} : vector<12x512xf32> to vector<1x256xf32>
    %c1_34 = arith.constant 1 : index
    %c0_35 = arith.constant 0 : index
    %62 = vector.load %arg10[%c1_34, %c0_35] : memref<2x3072xf32, #tpu.memory_space<vmem>>, vector<1x256xf32>
    tpu.vector_store %arg10[%c1_34, %c0_35], %61 {strides = array<i32>} : memref<2x3072xf32, #tpu.memory_space<vmem>>, vector<1x256xf32>,
    %63 = vector.extract_strided_slice %36 {offsets = [1, 256], sizes = [1, 256], strides = [1, 1]} : vector<12x512xf32> to vector<1x256xf32>
    %c1_36 = arith.constant 1 : index
    %c256_37 = arith.constant 256 : index
    %64 = vector.load %arg10[%c1_36, %c256_37] : memref<2x3072xf32, #tpu.memory_space<vmem>>, vector<1x256xf32>
    tpu.vector_store %arg10[%c1_36, %c256_37], %63 {strides = array<i32>} : memref<2x3072xf32, #tpu.memory_space<vmem>>, vector<1x256xf32>,
    %65 = vector.extract_strided_slice %36 {offsets = [2, 256], sizes = [1, 256], strides = [1, 1]} : vector<12x512xf32> to vector<1x256xf32>
    %c1_38 = arith.constant 1 : index
    %c512_39 = arith.constant 512 : index
    %66 = vector.load %arg10[%c1_38, %c512_39] : memref<2x3072xf32, #tpu.memory_space<vmem>>, vector<1x256xf32>
    tpu.vector_store %arg10[%c1_38, %c512_39], %65 {strides = array<i32>} : memref<2x3072xf32, #tpu.memory_space<vmem>>, vector<1x256xf32>,
    %67 = vector.extract_strided_slice %36 {offsets = [3, 256], sizes = [1, 256], strides = [1, 1]} : vector<12x512xf32> to vector<1x256xf32>
    %c1_40 = arith.constant 1 : index
    %c768_41 = arith.constant 768 : index
    %68 = vector.load %arg10[%c1_40, %c768_41] : memref<2x3072xf32, #tpu.memory_space<vmem>>, vector<1x256xf32>
    tpu.vector_store %arg10[%c1_40, %c768_41], %67 {strides = array<i32>} : memref<2x3072xf32, #tpu.memory_space<vmem>>, vector<1x256xf32>,
    %69 = vector.extract_strided_slice %36 {offsets = [4, 256], sizes = [1, 256], strides = [1, 1]} : vector<12x512xf32> to vector<1x256xf32>
    %c1_42 = arith.constant 1 : index
    %c1024_43 = arith.constant 1024 : index
    %70 = vector.load %arg10[%c1_42, %c1024_43] : memref<2x3072xf32, #tpu.memory_space<vmem>>, vector<1x256xf32>
    tpu.vector_store %arg10[%c1_42, %c1024_43], %69 {strides = array<i32>} : memref<2x3072xf32, #tpu.memory_space<vmem>>, vector<1x256xf32>,
    %71 = vector.extract_strided_slice %36 {offsets = [5, 256], sizes = [1, 256], strides = [1, 1]} : vector<12x512xf32> to vector<1x256xf32>
    %c1_44 = arith.constant 1 : index
    %c1280_45 = arith.constant 1280 : index
    %72 = vector.load %arg10[%c1_44, %c1280_45] : memref<2x3072xf32, #tpu.memory_space<vmem>>, vector<1x256xf32>
    tpu.vector_store %arg10[%c1_44, %c1280_45], %71 {strides = array<i32>} : memref<2x3072xf32, #tpu.memory_space<vmem>>, vector<1x256xf32>,
    %73 = vector.extract_strided_slice %36 {offsets = [6, 256], sizes = [1, 256], strides = [1, 1]} : vector<12x512xf32> to vector<1x256xf32>
    %c1_46 = arith.constant 1 : index
    %c1536_47 = arith.constant 1536 : index
    %74 = vector.load %arg10[%c1_46, %c1536_47] : memref<2x3072xf32, #tpu.memory_space<vmem>>, vector<1x256xf32>
    tpu.vector_store %arg10[%c1_46, %c1536_47], %73 {strides = array<i32>} : memref<2x3072xf32, #tpu.memory_space<vmem>>, vector<1x256xf32>,
    %75 = vector.extract_strided_slice %36 {offsets = [7, 256], sizes = [1, 256], strides = [1, 1]} : vector<12x512xf32> to vector<1x256xf32>
    %c1_48 = arith.constant 1 : index
    %c1792_49 = arith.constant 1792 : index
    %76 = vector.load %arg10[%c1_48, %c1792_49] : memref<2x3072xf32, #tpu.memory_space<vmem>>, vector<1x256xf32>
    tpu.vector_store %arg10[%c1_48, %c1792_49], %75 {strides = array<i32>} : memref<2x3072xf32, #tpu.memory_space<vmem>>, vector<1x256xf32>,
    %77 = vector.extract_strided_slice %36 {offsets = [8, 256], sizes = [1, 256], strides = [1, 1]} : vector<12x512xf32> to vector<1x256xf32>
    %c1_50 = arith.constant 1 : index
    %c2048_51 = arith.constant 2048 : index
    %78 = vector.load %arg10[%c1_50, %c2048_51] : memref<2x3072xf32, #tpu.memory_space<vmem>>, vector<1x256xf32>
    tpu.vector_store %arg10[%c1_50, %c2048_51], %77 {strides = array<i32>} : memref<2x3072xf32, #tpu.memory_space<vmem>>, vector<1x256xf32>,
    %79 = vector.extract_strided_slice %36 {offsets = [9, 256], sizes = [1, 256], strides = [1, 1]} : vector<12x512xf32> to vector<1x256xf32>
    %c1_52 = arith.constant 1 : index
    %c2304_53 = arith.constant 2304 : index
    %80 = vector.load %arg10[%c1_52, %c2304_53] : memref<2x3072xf32, #tpu.memory_space<vmem>>, vector<1x256xf32>
    tpu.vector_store %arg10[%c1_52, %c2304_53], %79 {strides = array<i32>} : memref<2x3072xf32, #tpu.memory_space<vmem>>, vector<1x256xf32>,
    %81 = vector.extract_strided_slice %36 {offsets = [10, 256], sizes = [1, 256], strides = [1, 1]} : vector<12x512xf32> to vector<1x256xf32>
    %c1_54 = arith.constant 1 : index
    %c2560_55 = arith.constant 2560 : index
    %82 = vector.load %arg10[%c1_54, %c2560_55] : memref<2x3072xf32, #tpu.memory_space<vmem>>, vector<1x256xf32>
    tpu.vector_store %arg10[%c1_54, %c2560_55], %81 {strides = array<i32>} : memref<2x3072xf32, #tpu.memory_space<vmem>>, vector<1x256xf32>,
    %83 = vector.extract_strided_slice %36 {offsets = [11, 256], sizes = [1, 256], strides = [1, 1]} : vector<12x512xf32> to vector<1x256xf32>
    %c1_56 = arith.constant 1 : index
    %c2816_57 = arith.constant 2816 : index
    %84 = vector.load %arg10[%c1_56, %c2816_57] : memref<2x3072xf32, #tpu.memory_space<vmem>>, vector<1x256xf32>
    tpu.vector_store %arg10[%c1_56, %c2816_57], %83 {strides = array<i32>} : memref<2x3072xf32, #tpu.memory_space<vmem>>, vector<1x256xf32>,
    %c0_58 = arith.constant 0 : index
    %c0_59 = arith.constant 0 : index
    %85 = vector.load %arg10[%c0_58, %c0_59] : memref<2x3072xf32, #tpu.memory_space<vmem>>, vector<2x3072xf32>
    %c0_60 = arith.constant 0 : index
    %c0_61 = arith.constant 0 : index
    %86 = vector.load %arg5[%c0_60, %c0_61] : memref<3072x128xf32, #tpu.memory_space<vmem>>, vector<3072x128xf32>
    %cst_62 = arith.constant dense<0.000000e+00> : vector<2x128xf32>
    %87 = tpu.matmul %85, %86, %cst_62 {dimension_numbers = #tpu.dot_dimension_numbers<[1], [0], [0], [1], [0, 0, 1, 1], [], []>} : vector<2x3072xf32>, vector<3072x128xf32>, vector<2x128xf32> -> vector<2x128xf32>
    %c0_63 = arith.constant 0 : index
    %c0_64 = arith.constant 0 : index
    %88 = vector.load %arg6[%c0_63, %c0_64] : memref<1x128xf32, #tpu.memory_space<vmem>>, vector<1x128xf32>
    %89 = vector.broadcast %88 : vector<1x128xf32> to vector<2x128xf32>
    %90 = arith.addf %87, %89 : vector<2x128xf32>
    %cst_65 = arith.constant 0.000000e+00 : f32
    %91 = vector.broadcast %cst_65 : f32 to vector<2x128xf32>
    %92 = arith.maximumf %90, %91 : vector<2x128xf32>
    %c0_66 = arith.constant 0 : index
    %c0_67 = arith.constant 0 : index
    %93 = vector.load %arg7[%c0_66, %c0_67] : memref<128x8xf32, #tpu.memory_space<vmem>>, vector<128x8xf32>
    %cst_68 = arith.constant dense<0.000000e+00> : vector<2x8xf32>
    %94 = tpu.matmul %92, %93, %cst_68 {dimension_numbers = #tpu.dot_dimension_numbers<[1], [0], [0], [1], [0, 0, 1, 1], [], []>} : vector<2x128xf32>, vector<128x8xf32>, vector<2x8xf32> -> vector<2x8xf32>
    %c0_69 = arith.constant 0 : index
    %c0_70 = arith.constant 0 : index
    %95 = vector.load %arg8[%c0_69, %c0_70] : memref<1x8xf32, #tpu.memory_space<vmem>>, vector<1x8xf32>
    %96 = vector.broadcast %95 : vector<1x8xf32> to vector<2x8xf32>
    %97 = arith.addf %94, %96 : vector<2x8xf32>
    %98 = tpu.iota {dimensions = array<i32: 1>} : vector<2x8xi32>
    %cst_71 = arith.constant 0.000000e+00 : f32
    %99 = vector.broadcast %cst_71 : f32 to vector<2x8xf32>
    %100 = arith.subf %99, %97 : vector<2x8xf32>
    %101 = math.exp %100 : vector<2x8xf32>
    %cst_72 = arith.constant 1.000000e+00 : f32
    %102 = vector.broadcast %cst_72 : f32 to vector<2x8xf32>
    %103 = arith.addf %102, %101 : vector<2x8xf32>
    %cst_73 = arith.constant 1.000000e+00 : f32
    %104 = vector.broadcast %cst_73 : f32 to vector<2x8xf32>
    %105 = arith.divf %104, %103 : vector<2x8xf32>
    %cst_74 = arith.constant 0.000000e+00 : f32
    %106 = vector.broadcast %cst_74 : f32 to vector<2x8xf32>
    %107 = arith.maximumf %97, %106 : vector<2x8xf32>
    %108 = math.absf %97 : vector<2x8xf32>
    %cst_75 = arith.constant 0.000000e+00 : f32
    %109 = vector.broadcast %cst_75 : f32 to vector<2x8xf32>
    %110 = arith.subf %109, %108 : vector<2x8xf32>
    %111 = math.exp %110 : vector<2x8xf32>
    %cst_76 = arith.constant 1.000000e+00 : f32
    %112 = vector.broadcast %cst_76 : f32 to vector<2x8xf32>
    %113 = arith.addf %112, %111 : vector<2x8xf32>
    %114 = math.log %113 : vector<2x8xf32>
    %115 = arith.addf %107, %114 : vector<2x8xf32>
    %c3_i32 = arith.constant 3 : i32
    %116 = vector.broadcast %c3_i32 : i32 to vector<2x8xi32>
    %117 = arith.cmpi slt, %98, %116 : vector<2x8xi32>
    %c6_i32 = arith.constant 6 : i32
    %118 = vector.broadcast %c6_i32 : i32 to vector<2x8xi32>
    %119 = arith.cmpi slt, %98, %118 : vector<2x8xi32>
    %120 = arith.select %119, %115, %97 : vector<2x8xi1>, vector<2x8xf32>
    %121 = arith.select %117, %105, %120 : vector<2x8xi1>, vector<2x8xf32>
    %c0_77 = arith.constant 0 : index
    %c0_78 = arith.constant 0 : index
    %122 = vector.load %arg9[%c0_77, %c0_78] : memref<2x8xf32, #tpu.memory_space<vmem>>, vector<2x8xf32>
    tpu.vector_store %arg9[%c0_77, %c0_78], %121 {strides = array<i32>} : memref<2x8xf32, #tpu.memory_space<vmem>>, vector<2x8xf32>,
    return
  }
}

</mosaic_0001>

<bundles_post_ra>
// kernel: policy_forward.1
= control target key start
LH: loop header
LB: loop body
LE: loop exit
PB: predicated region body
PF: predicated region fallthrough
CT: control target
= control target key end

     0   :  { %14 = vsyncpa [#allocation4], 0  ;;  %s4361_s0 = inlined_call_operand.vmem [shape: f32[2,3,256], index: 0, kind: input, shape index: {}]   ;;  %s4362_s1 = inlined_call_operand.hbm [shape: f32[6,27], index: 1, kind: input, shape index: {}]   ;;  %s4363_s2 = inlined_call_operand.vmem [shape: f32[6,1], index: 2, kind: input, shape index: {}]   ;;  %s4364_s3 = inlined_call_operand.hbm [shape: f32[12,24], index: 3, kind: input, shape index: {}]   ;;  %s4365_s4 = inlined_call_operand.vmem [shape: f32[12,1], index: 4, kind: input, shape index: {}]   ;;  %s4366_s5 = inlined_call_operand.hbm [shape: f32[3072,128], index: 5, kind: input, shape index: {}]   ;;  %s4367_s6 = inlined_call_operand.hbm [shape: f32[1,128], index: 6, kind: input, shape index: {}]   ;;  %s4368_s7 = inlined_call_operand.vmem [shape: f32[128,8], index: 7, kind: input, shape index: {}]   ;;  %s4369_s8 = inlined_call_operand.hbm [shape: f32[1,8], index: 8, kind: input, shape index: {}]   ;;  %s4370_s9 = inlined_call_operand.vmem [shape: f32[2,8], index: 9, kind: output, shape index: {}]  }
   0x1   :  { %15 = vsyncpa [#allocation6], 0 }
   0x2   :  { %16 = vsyncpa [#allocation9], 0  ;;  %s3663_s30 = smov [#allocation5]   ;;  %s3547_s13 = scalar_lea.hbm %s4364_s3, 256 }
   0x3   :  { %s36_s10 = sshll.u32 %s3663_s30, 4  ;;  %p3548_p0 = scmp.ne.s32.totalorder %s4364_s3, %s3547_s13  ;;  %s37_s10 = int_to_ptr.vmem [resolvable:$true] %s36_s10 }
   0x4   :  { %p3551_p1 = scmp.lt.u32.totalorder %s3547_s13, %s4364_s3 }
   0x6   :  { %p3553_p2 = pnand %p3551_p1, %p3548_p0 }
   0x8   :  { %3556 = shalt.err (!%p3553_p2)
}
   0x9   :  { %s3557_s18 = scalar_lea.vmem %s37_s10, 256  ;;  %p3562_p4 = scmp.lt.s32.totalorder %s37_s10, %s37_s10 }
   0xa   :  { %p3558_p3 = scmp.ne.s32.totalorder %s37_s10, %s3557_s18  ;;  %p3563_p5 = scmp.lt.s32.totalorder %s3557_s18, %s3557_s18 }
   0xc   :  { %p3564_p6 = por %p3563_p5, %p3562_p4 }
   0xe   :  { %p3565_p7 = pnand %p3564_p6, %p3558_p3 }
  0x10   :  { %3568 = shalt.err (!%p3565_p7)
}
  0x11   :  { %s3664_s19 = smov 128   ;;  %s3665_s20 = smov 8  }
  0x12   :  { %42 = dma.hbm_to_vmem [thread:$0]  %s4364_s3, 256, %s37_s10, [#allocation6], %s3664_s19, %s3664_s19, %s3665_s20  }
  0x13   :  { %s3666_s23 = smov [#allocation8]   ;;  %s3667_s25 = smov [#allocation3]  }
  0x14   :  { %s63_s24 = sshll.u32 %s3666_s23, 4  ;;  %s25_s26 = sshll.u32 %s3667_s25, 4  ;;  %s64_s24 = int_to_ptr.vmem [resolvable:$true] %s63_s24  ;;  %s26_s26 = int_to_ptr.vmem [resolvable:$true] %s25_s26 }
  0x15   :  { %s3569_s29 = scalar_lea.hbm %s4367_s6, 16 }
  0x16   :  { %p3570_p8 = scmp.ne.s32.totalorder %s4367_s6, %s3569_s29  ;;  %p3573_p9 = scmp.lt.u32.totalorder %s3569_s29, %s4367_s6 }
  0x18   :  { %p3575_p10 = pnand %p3573_p9, %p3570_p8 }
  0x1a   :  { %3578 = shalt.err (!%p3575_p10)
}
  0x1b   :  { %s3579_s3 = scalar_lea.vmem %s64_s24, 16  ;;  %s3583_s10 = scalar_lea.vmem %s64_s24, 32 }
  0x1c   :  { %p3580_p11 = scmp.ne.s32.totalorder %s64_s24, %s3579_s3  ;;  %p3584_p12 = scmp.lt.s32.totalorder %s64_s24, %s64_s24 }
  0x1d   :  { %p3585_p13 = scmp.lt.s32.totalorder %s3583_s10, %s3579_s3 }
  0x1f   :  { %p3586_p0 = por %p3585_p13, %p3584_p12 }
  0x21   :  { %p3587_p1 = pnand %p3586_p0, %p3580_p11 }
  0x23   :  { %3590 = shalt.err (!%p3587_p1)
}
  0x24   :  { %66 = dma.hbm_to_vmem [thread:$0]  %s4367_s6, 16, %s64_s24, [#allocation9]  }
  0x25   :  { %s3591_s18 = scalar_lea.hbm %s4362_s1, 128 }
  0x26   :  { %p3592_p2 = scmp.ne.s32.totalorder %s4362_s1, %s3591_s18  ;;  %p3595_p3 = scmp.lt.u32.totalorder %s3591_s18, %s4362_s1 }
  0x28   :  { %p3597_p4 = pnand %p3595_p3, %p3592_p2 }
  0x2a   :  { %3600 = shalt.err (!%p3597_p4)
}
  0x2b   :  { %s3601_s27 = scalar_lea.vmem %s26_s26, 128  ;;  %p3606_p6 = scmp.lt.s32.totalorder %s26_s26, %s26_s26 }
  0x2c   :  { %p3602_p5 = scmp.ne.s32.totalorder %s26_s26, %s3601_s27  ;;  %p3607_p7 = scmp.lt.s32.totalorder %s3601_s27, %s3601_s27 }
  0x2e   :  { %p3608_p8 = por %p3607_p7, %p3606_p6 }
  0x30   :  { %p3609_p9 = pnand %p3608_p8, %p3602_p5 }
  0x32   :  { %3612 = shalt.err (!%p3609_p9)
}
  0x33   :  { %28 = dma.hbm_to_vmem [thread:$0]  %s4362_s1, 128, %s26_s26, [#allocation4]  }
  0x34   :  { %s3668_s28 = smov [#allocation7]   ;;  %s3669_s30 = smov [#allocation10]  }
  0x35   :  { %s50_s29 = sshll.u32 %s3668_s28, 4  ;;  %s75_s11 = sshll.u32 %s3669_s30, 4  ;;  %s51_s29 = int_to_ptr.vmem [resolvable:$true] %s50_s29  ;;  %s76_s11 = int_to_ptr.vmem [resolvable:$true] %s75_s11 }
  0x36   :  { %s3613_s3 = scalar_lea.hbm %s4366_s5, 49152 }
  0x37   :  { %p3614_p10 = scmp.ne.s32.totalorder %s4366_s5, %s3613_s3  ;;  %p3617_p11 = scmp.lt.u32.totalorder %s3613_s3, %s4366_s5 }
  0x39   :  { %p3619_p12 = pnand %p3617_p11, %p3614_p10 }
  0x3b   :  { %3622 = shalt.err (!%p3619_p12)
}
  0x3c   :  { %s3623_s1 = scalar_lea.vmem %s51_s29, 49152  ;;  %p3628_p0 = scmp.lt.s32.totalorder %s51_s29, %s51_s29 }
  0x3d   :  { %p3624_p13 = scmp.ne.s32.totalorder %s51_s29, %s3623_s1  ;;  %p3629_p1 = scmp.lt.s32.totalorder %s3623_s1, %s3623_s1 }
  0x3f   :  { %p3630_p2 = por %p3629_p1, %p3628_p0 }
  0x41   :  { %p3631_p3 = pnand %p3630_p2, %p3624_p13 }
  0x43   :  { %3634 = shalt.err (!%p3631_p3)
}
  0x44   :  { %56 = dma.hbm_to_vmem [thread:$0]  %s4366_s5, 49152, %s51_s29, [#allocation6], %s3664_s19, %s3664_s19, %s3665_s20  }
  0x45   :  { %s3635_s22 = scalar_lea.hbm %s4369_s8, 16 }
  0x46   :  { %p3636_p4 = scmp.ne.s32.totalorder %s4369_s8, %s3635_s22  ;;  %p3639_p5 = scmp.lt.u32.totalorder %s3635_s22, %s4369_s8 }
  0x48   :  { %p3641_p6 = pnand %p3639_p5, %p3636_p4 }
  0x4a   :  { %3644 = shalt.err (!%p3641_p6)
}
  0x4b   :  { %s3645_s24 = scalar_lea.vmem %s76_s11, 16  ;;  %s3649_s28 = scalar_lea.vmem %s76_s11, 32 }
  0x4c   :  { %p3646_p7 = scmp.ne.s32.totalorder %s76_s11, %s3645_s24  ;;  %p3650_p8 = scmp.lt.s32.totalorder %s76_s11, %s76_s11 }
  0x4d   :  { %p3651_p9 = scmp.lt.s32.totalorder %s3649_s28, %s3645_s24 }
  0x4f   :  { %p3652_p10 = por %p3651_p9, %p3650_p8 }
  0x51   :  { %p3653_p11 = pnand %p3652_p10, %p3646_p7 }
  0x53   :  { %3656 = shalt.err (!%p3653_p11)
}
  0x54   :  { %78 = dma.hbm_to_vmem [thread:$0]  %s4369_s8, 16, %s76_s11, [#allocation9]  }
  0x55   :  { %3657 = dma.done.wait [#allocation4], 128  }
  0x56   :  { %3658 = vsyncadd [#allocation4], 4294967168 }
  0x57   :  { %3659 = dma.done.wait [#allocation6], 49408  }
  0x58   :  { %3660 = vsyncadd [#allocation6], 4294917888 }
  0x59   :  { %3661 = dma.done.wait [#allocation9], 32  }
  0x5a   :  { %3662 = vsyncadd [#allocation9], 4294967264  ;;  %v94_v0 = vld [vmem:[%s4361_s0] sm:$0x77]  ;;  %v2530_v1 = vld [vmem:[%s4361_s0 + $0x8] sm:$0x77]  ;;  %v111_v6 = vlaneseq }
  0x5b   :  { %v98_v2 = vcombine.high %v94_v0, %v94_v0  ;;  %v101_v3 = vcombine.high %v2530_v1, %v2530_v1  ;;  %s3670_s13 = smov 96   ;;  %s3671_s8 = smov 112   ;;  %vm155_vm2 = vcmask 1042432   ;;  %vm160_vm3 = vcmask 1045504   ;;  %v278_v52 = vld [vmem:[%s4363_s2] sm:$0x3f] }
  0x5c   :  { %v3806_v7 = vand.u32 127, %v111_v6  ;;  %s3672_s0 = smov 127   ;;  %s3673_s11 = smov 126   ;;  %v3674_v51 = vmov 0.0   ;;  %v3675_v53 = vmov 0   ;;  %vm223_vm6 = vcmask 1040384  }
  0x5d   :  { %v3479_v4 = vpack.i.bf16 %v2530_v1, %v98_v2  ;;  %v3484_v5 = vpack.i.bf16 %v94_v0, %v101_v3  ;;  %360 = vmatprep.mubr.f32.mxu1 %v3674_v51  ;;  %3529 = vset.pattern.permute.xlu0 %v3675_v53  ;;  %vm252_vm7 = vcmask 1041408   ;;  %vm3676_vm8 = vmmov 1  }
  0x5e   :  { %vm113_vm0 = vcmp.lt.s32.totalorder %v3806_v7, 112  ;;  %vm126_vm1 = vcmp.lt.s32.totalorder %v3806_v7, 96  ;;  %3530 = vset.pattern.permute.xlu1 %v3675_v53  ;;  %vm181_vm4 = vcmp.lt.s32.totalorder %v3806_v7, 127  ;;  %vm206_vm5 = vcmp.lt.s32.totalorder %v3806_v7, 126  ;;  %vm3913_vm9 = vmpackc.low %vm155_vm2, %vm3676_vm8 }
  0x5f   :  { %3480 = vrot.lane.b32.xlu1 %v3479_v4, %s3670_s13  ;;  %3470 = vrot.lane.b32.xlu0 %v3479_v4, %s3671_s8  ;;  %vm284_vm10 = vcmask 220160   ;;  %vm534_vm11 = vcmask 1043456   ;;  %vm573_vm12 = vcmask 195584   ;;  %vm4140_vm13 = vcmp.lt.s32.totalorder %v111_v6, 256 }
  0x60   :  { %vm3680_vm14 = vmmov 0   ;;  %vm2518_vm15 = vcmp.lt.s32.totalorder %v3806_v7, 6 }
  0x63   :  { %3485 = vrot.lane.b32.xlu1 %v3484_v5, %s3670_s13  ;;  %3475 = vrot.lane.b32.xlu0 %v3484_v5, %s3671_s8 }
  0xd1   :  { %v3481_v8 = vpop.permute.xlu1 %3480  ;;  %v3471_v9 = vpop.permute.xlu0 %3470 }
  0xd2   :  { %v3473_v10 = vunpack.i.h.bf16 %v3471_v9  ;;  %v3472_v11 = vunpack.i.l.bf16 %v3471_v9  ;;  %v3483_v12 = vunpack.i.h.bf16 %v3481_v8  ;;  %v3482_v13 = vunpack.i.l.bf16 %v3481_v8 }
  0xd4   :  { %v115_v14 = vsel %vm113_vm0, %v3472_v11, %v3473_v10  ;;  %v128_v21 = vsel %vm126_vm1, %v3482_v13, %v3483_v12 }
  0xd5   :  { %v3486_v15 = vpop.permute.xlu1 %3485  ;;  %v3476_v16 = vpop.permute.xlu0 %3475  ;;  %v136_v22 = vrot.slane %v115_v14, 5  ;;  %v3826_v29 = vrot.slane %v128_v21, 2 }
  0xd6   :  { %v3488_v17 = vunpack.i.h.bf16 %v3486_v15  ;;  %v3487_v18 = vunpack.i.l.bf16 %v3486_v15  ;;  %v3478_v19 = vunpack.i.h.bf16 %v3476_v16  ;;  %v3477_v20 = vunpack.i.l.bf16 %v3476_v16 }
  0xd7   :  { %v157_v34 = vsel %vm155_vm2, %v98_v2, %v136_v22 }
  0xd8   :  { %v127_v23 = vsel %vm126_vm1, %v3483_v12, %v3487_v18  ;;  %v129_v24 = vsel %vm126_vm1, %v3488_v17, %v3482_v13  ;;  %v114_v25 = vsel %vm113_vm0, %v3473_v10, %v3477_v20  ;;  %v116_v28 = vsel %vm113_vm0, %v3478_v19, %v3472_v11 }
  0xd9   :  { %v3820_v26 = vrot.slane %v129_v24, 2  ;;  %v3822_v27 = vrot.slane %v127_v23, 2  ;;  %v117_v30 = vsel %vm113_vm0, %v3477_v20, %v3478_v19  ;;  %v135_v31 = vrot.slane %v116_v28, 5 }
  0xda   :  { %v137_v32 = vrot.slane %v114_v25, 5  ;;  %v130_v37 = vsel %vm126_vm1, %v3487_v18, %v3488_v17  ;;  %v138_v38 = vrot.slane %v117_v30, 5  ;;  %v3850_v42 = vsel %vm160_vm3, %v157_v34, %v3826_v29 }
  0xdb   :  { %v3489_v33 = vpack.i.bf16 %v3820_v26, %v3822_v27  ;;  %v156_v35 = vsel %vm155_vm2, %v94_v0, %v135_v31  ;;  %v3854_v44 = vrot.slane %v130_v37, 2  ;;  %v3504_v46 = vpack.i.bf16 %v3826_v29, %v3850_v42 }
  0xdc   :  { %v158_v36 = vsel %vm155_vm2, %v2530_v1, %v137_v32  ;;  %v3840_v39 = vsel %vm160_vm3, %v156_v35, %v3820_v26  ;;  %v159_v45 = vsel %vm155_vm2, %v101_v3, %v138_v38  ;;  %vm2521_vm1 = vcmask 58368  }
  0xdd   :  { %3490 = vrot.lane.b32.xlu0 %v3489_v33, %s3672_s0  ;;  %v3844_v40 = vsel %vm160_vm3, %v158_v36, %v3822_v27  ;;  %v3499_v41 = vpack.i.bf16 %v3826_v29, %v3840_v39  ;;  %v3865_v48 = vsel %vm160_vm3, %v159_v45, %v3854_v44  ;;  %v3514_v49 = vpack.i.bf16 %v3820_v26, %v3840_v39 }
  0xde   :  { %v3494_v43 = vpack.i.bf16 %v3844_v40, %v3850_v42  ;;  %v3509_v47 = vpack.i.bf16 %v3822_v27, %v3844_v40  ;;  %v3519_v50 = vpack.i.bf16 %v3854_v44, %v3865_v48 }
  0xdf   :  { %3500 = vrot.lane.b32.xlu1 %v3499_v41, %s3672_s0 }
  0xe1   :  { %3495 = vrot.lane.b32.xlu0 %v3494_v43, %s3672_s0 }
  0xe3   :  { %3505 = vrot.lane.b32.xlu1 %v3504_v46, %s3673_s11 }
  0xe5   :  { %3510 = vrot.lane.b32.xlu0 %v3509_v47, %s3673_s11 }
  0xe7   :  { %3515 = vrot.lane.b32.xlu1 %v3514_v49, %s3673_s11 }
  0xe9   :  { %3520 = vrot.lane.b32.xlu0 %v3519_v50, %s3672_s0 }
  0xeb   :  { %3525 = vrot.lane.b32.xlu1 %v3519_v50, %s3673_s11 }
  0xed   :  { %281 = vperm.xlu0 %3529, %v278_v52  }
 0x14f   :  { %v3491_v54 = vpop.permute.xlu0 %3490 }
 0x150   :  { %v3492_v58 = vunpack.i.l.bf16 %v3491_v54  ;;  %v3493_v2 = vunpack.i.h.bf16 %v3491_v54 }
 0x151   :  { %v3501_v55 = vpop.permute.xlu1 %3500 }
 0x152   :  { %v3503_v56 = vunpack.i.h.bf16 %v3501_v55  ;;  %v3502_v59 = vunpack.i.l.bf16 %v3501_v55 }
 0x153   :  { %v3496_v57 = vpop.permute.xlu0 %3495 }
 0x154   :  { %v3498_v60 = vunpack.i.h.bf16 %v3496_v57  ;;  %v3497_v61 = vunpack.i.l.bf16 %v3496_v57  ;;  %v185_v62 = vsel %vm181_vm4, %v3503_v56, %v3492_v58  ;;  %v187_v12 = vsel %vm181_vm4, %v3493_v2, %v3503_v56 }
 0x155   :  { %v3506_v0 = vpop.permute.xlu1 %3505  ;;  %v230_v13 = vrot.slane %v185_v62, 7  ;;  %v228_v28 = vrot.slane %v187_v12, 7 }
 0x156   :  { %v186_v63 = vsel %vm181_vm4, %v3502_v59, %v3497_v61  ;;  %v184_v1 = vsel %vm181_vm4, %v3497_v61, %v3498_v60  ;;  %v3508_v8 = vunpack.i.h.bf16 %v3506_v0  ;;  %v3507_v9 = vunpack.i.l.bf16 %v3506_v0 }
 0x157   :  { %v224_v3 = vrot.slane %v186_v63, 7  ;;  %v3511_v4 = vpop.permute.xlu0 %3510  ;;  %v225_v5 = vrot.slane %v184_v1, 7 }
 0x158   :  { %v3513_v10 = vunpack.i.h.bf16 %v3511_v4  ;;  %v3512_v11 = vunpack.i.l.bf16 %v3511_v4 }
 0x159   :  { %v270_v14 = vsel %vm223_vm6, %v3826_v29, %v225_v5  ;;  %v269_v15 = vsel %vm223_vm6, %v3820_v26, %v224_v3  ;;  %v3516_v18 = vpop.permute.xlu1 %3515  ;;  %v231_v32 = vsel %vm223_vm6, %v225_v5, %v230_v13  ;;  %v229_v43 = vsel %vm223_vm6, %v224_v3, %v228_v28 }
 0x15a   :  { %v210_v16 = vsel %vm206_vm5, %v3508_v8, %v3513_v10  ;;  %v209_v17 = vsel %vm206_vm5, %v3507_v9, %v3512_v11  ;;  %v3015_v19 = vpack.c.bf16 %v270_v14, %v3850_v42  ;;  %v3017_v20 = vpack.c.bf16 %v269_v15, %v3840_v39 }
 0x15b   :  { %v259_v21 = vrot.slane %v210_v16, 6  ;;  %v254_v22 = vrot.slane %v209_v17, 6  ;;  %v3518_v23 = vunpack.i.h.bf16 %v3516_v18  ;;  %v3517_v24 = vunpack.i.l.bf16 %v3516_v18  ;;  %v3521_v25 = vpop.permute.xlu0 %3520 }
 0x15c   :  { %v3523_v29 = vunpack.i.h.bf16 %v3521_v25  ;;  %v3522_v30 = vunpack.i.l.bf16 %v3521_v25  ;;  %3016 = vmatprep.subr.bf16.mxu1 %v3015_v19 }
 0x15d   :  { %v211_v26 = vsel %vm206_vm5, %v3517_v24, %v3507_v9  ;;  %v212_v31 = vsel %vm206_vm5, %v3518_v23, %v3508_v8  ;;  %3018 = vmatpush1.bf16.msra.mxu1 %v3017_v20  ;;  %v260_v33 = vsel %vm252_vm7, %v254_v22, %v259_v21  ;;  %v3526_v37 = vpop.permute.xlu1 %3525  ;;  %v274_v38 = vsel %vm252_vm7, %v231_v32, %v254_v22  ;;  %v277_v8 = vld [vmem:[#allocation3] sm:$0x3f] }
 0x15e   :  { %v253_v34 = vrot.slane %v211_v26, 6  ;;  %v257_v35 = vrot.slane %v212_v31, 6  ;;  %v183_v36 = vsel %vm181_vm4, %v3492_v58, %v3523_v29  ;;  %v189_v39 = vsel %vm181_vm4, %v3523_v29, %v3493_v2 }
 0x15f   :  { %v182_v41 = vsel %vm181_vm4, %v3498_v60, %v3522_v30  ;;  %v188_v42 = vsel %vm181_vm4, %v3522_v30, %v3502_v59  ;;  %v232_v45 = vrot.slane %v183_v36, 7  ;;  %v3528_v47 = vunpack.i.h.bf16 %v3526_v37 }
 0x160   :  { %v227_v46 = vrot.slane %v188_v42, 7  ;;  %v3527_v49 = vunpack.i.l.bf16 %v3526_v37  ;;  %v226_v52 = vrot.slane %v182_v41, 7  ;;  %v3019_v53 = vpack.c.bf16 %v260_v33, %v274_v38 }
 0x161   :  { %v258_v54 = vsel %vm252_vm7, %v253_v34, %v257_v35  ;;  %v273_v55 = vsel %vm252_vm7, %v229_v43, %v253_v34  ;;  %v234_v56 = vrot.slane %v189_v39, 7  ;;  %v208_v58 = vsel %vm206_vm5, %v3513_v10, %v3528_v47 }
 0x162   :  { %v207_v57 = vsel %vm206_vm5, %v3512_v11, %v3527_v49  ;;  %v213_v59 = vsel %vm206_vm5, %v3527_v49, %v3517_v24  ;;  %v214_v60 = vsel %vm206_vm5, %v3528_v47, %v3518_v23  ;;  %3021 = vmatprep.subr.msk.bf16.mxu1 %vm3913_vm9, %v3019_v53  ;;  %v3022_v63 = vpack.c.bf16 %v258_v54, %v273_v55 }
 0x163   :  { %v256_v61 = vrot.slane %v213_v59, 6  ;;  %v263_v62 = vrot.slane %v214_v60, 6  ;;  %v272_v0 = vsel %vm223_vm6, %v3854_v44, %v227_v46  ;;  %v255_v1 = vrot.slane %v207_v57, 6 }
 0x164   :  { %v261_v2 = vrot.slane %v208_v58, 6  ;;  %v3025_v3 = vpack.c.bf16 %v272_v0, %v3865_v48  ;;  %v271_v4 = vsel %vm223_vm6, %v3822_v27, %v226_v52  ;;  %v233_v5 = vsel %vm223_vm6, %v226_v52, %v232_v45  ;;  %3024 = vmatpush1.bf16.msk.msra.mxu1 %vm3913_vm9, %v3022_v63 }
 0x165   :  { %v235_v9 = vsel %vm223_vm6, %v227_v46, %v234_v56  ;;  %v264_v10 = vsel %vm252_vm7, %v256_v61, %v263_v62  ;;  %v3027_v11 = vpack.c.bf16 %v271_v4, %v3844_v40  ;;  %v275_v27 = vsel %vm252_vm7, %v233_v5, %v255_v1 }
 0x166   :  { %3026 = vmatprep.subr.bf16.mxu1 %v3025_v3  ;;  %v276_v44 = vsel %vm252_vm7, %v235_v9, %v256_v61  ;;  %v262_v12 = vsel %vm252_vm7, %v255_v1, %v261_v2  ;;  %v561_v9 = vld [vmem:[%s4365_s4] sm:$0xff] }
 0x167   :  { %v3029_v48 = vpack.c.bf16 %v264_v10, %v276_v44  ;;  %2533 = vmatmul.mubr.msk.f32.vlgmr.msra.gmra.mrb[0].mxu1 %vm284_vm10, %v277_v8  ;;  %v3032_v13 = vpack.c.bf16 %v262_v12, %v275_v27 }
 0x168   :  { %3028 = vmatpush1.bf16.msra.mxu1 %v3027_v11  ;;  %431 = vmatprep.mubr.f32.mxu1 %v3674_v51 }
 0x169   :  { %3031 = vmatprep.subr.msk.bf16.mxu1 %vm3913_vm9, %v3029_v48 }
 0x16c   :  { %3034 = vmatpush1.bf16.msk.msra.mxu1 %vm3913_vm9, %v3032_v13  ;;  %v282_v40 = vpop.permute.xlu0 %281 }
 0x16f   :  { %2536 = vmatmul.mubr.msk.f32.vlgmr.msra.gmra.mrb[2].mxu1 %vm284_vm10, %v277_v8 }
 0x170   :  { %644 = vmatprep.mubr.f32.mxu1 %v3674_v51 }
 0x23a   :  { %v362_v14 = vpop.f32.mrb[0].mxu1 }
 0x23b   :  { %v363_v15 = vadd.f32 %v362_v14, %v282_v40  ;;  %v364_v16 = vpop.f32.mrb[1].mxu1 }
 0x23c   :  { %v365_v18 = vadd.f32 %v364_v16, %v282_v40 }
 0x23d   :  { %v438_v17 = vmax.f32 %v363_v15, 0.0 }
 0x23e   :  { %v439_v19 = vmax.f32 %v365_v18, 0.0 }
 0x23f   :  { %442 = vrot.lane.b32.xlu1 %v438_v17, %s3672_s0 }
 0x242   :  { %v433_v20 = vpop.f32.mrb[2].mxu1 }
 0x243   :  { %v434_v21 = vadd.f32 %v433_v20, %v282_v40  ;;  %v435_v22 = vpop.f32.mrb[3].mxu1  ;;  %444 = vrot.lane.b32.xlu1 %v439_v19, %s3672_s0 }
 0x244   :  { %v436_v23 = vadd.f32 %v435_v22, %v282_v40 }
 0x245   :  { %v440_v24 = vmax.f32 %v434_v21, 0.0 }
 0x246   :  { %v441_v25 = vmax.f32 %v436_v23, 0.0 }
 0x247   :  { %446 = vrot.lane.b32.xlu0 %v440_v24, %s3672_s0 }
 0x248   :  { %448 = vrot.lane.b32.xlu1 %v441_v25, %s3672_s0 }
 0x2b1   :  { %v443_v28 = vpop.permute.xlu1 %442 }
 0x2b5   :  { %v445_v29 = vpop.permute.xlu1 %444 }
 0x2b6   :  { %v452_v30 = vsel %vm181_vm4, %v443_v28, %v445_v29 }
 0x2b7   :  { %v454_v26 = vmax.f32 %v438_v17, %v452_v30 }
 0x2b9   :  { %v447_v31 = vpop.permute.xlu0 %446  ;;  %458 = vrot.lane.b32.xlu0 %v454_v26, %s3671_s8 }
 0x2ba   :  { %v451_v32 = vsel %vm181_vm4, %v445_v29, %v447_v31  ;;  %v449_v33 = vpop.permute.xlu1 %448 }
 0x2bb   :  { %v455_v34 = vmax.f32 %v439_v19, %v451_v32  ;;  %v450_v35 = vsel %vm181_vm4, %v447_v31, %v449_v33  ;;  %v453_v36 = vsel %vm181_vm4, %v449_v33, %v443_v28  ;;  %v559_v31 = vld [vmem:[#allocation5] sm:$0xff] }
 0x2bc   :  { %v456_v37 = vmax.f32 %v440_v24, %v450_v35  ;;  %v457_v38 = vmax.f32 %v441_v25, %v453_v36 }
 0x2bd   :  { %460 = vrot.lane.b32.xlu1 %v455_v34, %s3671_s8 }
 0x2be   :  { %462 = vrot.lane.b32.xlu0 %v456_v37, %s3671_s8 }
 0x2c1   :  { %464 = vrot.lane.b32.xlu1 %v457_v38, %s3671_s8 }
 0x32b   :  { %v459_v39 = vpop.permute.xlu0 %458 }
 0x32f   :  { %v461_v41 = vpop.permute.xlu1 %460 }
 0x330   :  { %v463_v42 = vpop.permute.xlu0 %462  ;;  %v468_v53 = vsel %vm113_vm0, %v459_v39, %v461_v41 }
 0x331   :  { %v467_v43 = vsel %vm113_vm0, %v461_v41, %v463_v42  ;;  %v470_v54 = vmax.f32 %v454_v26, %v468_v53 }
 0x332   :  { %v471_v45 = vmax.f32 %v455_v34, %v467_v43 }
 0x333   :  { %v465_v46 = vpop.permute.xlu1 %464 }
 0x334   :  { %v466_v47 = vsel %vm113_vm0, %v463_v42, %v465_v46  ;;  %v469_v49 = vsel %vm113_vm0, %v465_v46, %v459_v39  ;;  %476 = vrot.lane.b32.xlu0 %v471_v45, %s3671_s8  ;;  %v560_v42 = vld [vmem:[#allocation5 + $0x8] sm:$0xf] }
 0x335   :  { %v472_v50 = vmax.f32 %v456_v37, %v466_v47  ;;  %v473_v52 = vmax.f32 %v457_v38, %v469_v49 }
 0x337   :  { %478 = vrot.lane.b32.xlu1 %v472_v50, %s3671_s8 }
 0x338   :  { %480 = vrot.lane.b32.xlu0 %v473_v52, %s3671_s8 }
 0x33b   :  { %474 = vrot.lane.b32.xlu1 %v470_v54, %s3671_s8 }
 0x3a6   :  { %v477_v55 = vpop.permute.xlu0 %476 }
 0x3a9   :  { %v479_v56 = vpop.permute.xlu1 %478 }
 0x3aa   :  { %v483_v57 = vsel %vm113_vm0, %v477_v55, %v479_v56  ;;  %v481_v58 = vpop.permute.xlu0 %480 }
 0x3ab   :  { %v491_v59 = vrot.slane %v483_v57, 2  ;;  %v482_v60 = vsel %vm113_vm0, %v479_v56, %v481_v58 }
 0x3ac   :  { %v492_v61 = vrot.slane %v482_v60, 2 }
 0x3ad   :  { %v475_v62 = vpop.permute.xlu1 %474  ;;  %v499_v63 = vsel %vm160_vm3, %v471_v45, %v491_v59 }
 0x3ae   :  { %v484_v0 = vsel %vm113_vm0, %v475_v62, %v477_v55  ;;  %506 = vrot.lane.b32.xlu0 %v499_v63, %s3672_s0  ;;  %v500_v1 = vsel %vm160_vm3, %v472_v50, %v492_v61  ;;  %v485_v4 = vsel %vm113_vm0, %v481_v58, %v475_v62 }
 0x3af   :  { %v490_v2 = vrot.slane %v484_v0, 2  ;;  %510 = vrot.lane.b32.xlu1 %v500_v1, %s3672_s0  ;;  %v493_v5 = vrot.slane %v485_v4, 2  ;;  %v562_v0 = vld [vmem:[%s4365_s4 + $0x8] sm:$0xf]  ;;  %v1062_v4 = vld [vmem:[#allocation7 + $0x88] sm:$0xff] }
 0x3b1   :  { %v498_v3 = vsel %vm160_vm3, %v470_v54, %v490_v2  ;;  %v501_v8 = vsel %vm160_vm3, %v473_v52, %v493_v5 }
 0x3b2   :  { %502 = vrot.lane.b32.xlu0 %v498_v3, %s3672_s0 }
 0x3b3   :  { %508 = vrot.lane.b32.xlu1 %v491_v59, %s3672_s0 }
 0x3b6   :  { %512 = vrot.lane.b32.xlu0 %v492_v61, %s3672_s0 }
 0x3b7   :  { %504 = vrot.lane.b32.xlu1 %v490_v2, %s3672_s0 }
 0x3ba   :  { %514 = vrot.lane.b32.xlu0 %v501_v8, %s3672_s0 }
 0x3bb   :  { %516 = vrot.lane.b32.xlu1 %v493_v5, %s3672_s0 }
 0x3be   :  { %565 = vperm.xlu0 %3529, %v561_v9   ;;  %v1046_v9 = vld [vmem:[#allocation7 + $0x8] sm:$0xff] }
 0x420   :  { %v507_v10 = vpop.permute.xlu0 %506 }
 0x421   :  { %v511_v44 = vpop.permute.xlu1 %510 }
 0x422   :  { %v520_v11 = vsel %vm181_vm4, %v507_v10, %v511_v44 }
 0x423   :  { %v536_v48 = vrot.slane %v520_v11, 4 }
 0x424   :  { %v503_v12 = vpop.permute.xlu0 %502 }
 0x425   :  { %v522_v27 = vsel %vm181_vm4, %v503_v12, %v507_v10  ;;  %v509_v13 = vpop.permute.xlu1 %508  ;;  %v556_v40 = vsel %vm534_vm11, %v491_v59, %v536_v48  ;;  %v1093_v10 = vld [vmem:[#allocation7 + $0x180] sm:$0xff] }
 0x426   :  { %v535_v14 = vrot.slane %v522_v27, 4  ;;  %v3035_v15 = vpack.c.bf16 %v556_v40, %v499_v63  ;;  %v1078_v27 = vld [vmem:[#allocation7 + $0x108] sm:$0xff] }
 0x428   :  { %v555_v16 = vsel %vm534_vm11, %v490_v2, %v535_v14  ;;  %v513_v17 = vpop.permute.xlu0 %512  ;;  %3036 = vmatprep.subr.bf16.mxu1 %v3035_v15 }
 0x429   :  { %v521_v18 = vsel %vm181_vm4, %v509_v13, %v513_v17  ;;  %v505_v19 = vpop.permute.xlu1 %504  ;;  %v3037_v20 = vpack.c.bf16 %v555_v16, %v498_v3  ;;  %v1061_v3 = vld [vmem:[#allocation7 + $0x80] sm:$0xff]  ;;  %v1047_v16 = vld [vmem:[#allocation7 + $0x10] sm:$0xff] }
 0x42a   :  { %v541_v21 = vrot.slane %v521_v18, 4  ;;  %v523_v22 = vsel %vm181_vm4, %v505_v19, %v509_v13  ;;  %v1063_v13 = vld [vmem:[#allocation7 + $0x90] sm:$0xff] }
 0x42b   :  { %v539_v23 = vrot.slane %v523_v22, 4  ;;  %3038 = vmatpush1.bf16.msra.mxu1 %v3037_v20  ;;  %v1096_v20 = vld [vmem:[#allocation7 + $0x198] sm:$0xff] }
 0x42c   :  { %v515_v24 = vpop.permute.xlu0 %514  ;;  %v542_v25 = vsel %vm534_vm11, %v536_v48, %v541_v21 }
 0x42d   :  { %v518_v28 = vsel %vm181_vm4, %v511_v44, %v515_v24  ;;  %v524_v29 = vsel %vm181_vm4, %v515_v24, %v503_v12  ;;  %584 = vmatprep.subr.mxu1 %v542_v25  ;;  %v517_v30 = vpop.permute.xlu1 %516  ;;  %v540_v26 = vsel %vm534_vm11, %v535_v14, %v539_v23  ;;  %v1094_v44 = vld [vmem:[#allocation7 + $0x188] sm:$0xff]  ;;  %v1077_v12 = vld [vmem:[#allocation7 + $0x100] sm:$0xff]  ;;  %v1064_v14 = vld [vmem:[#allocation7 + $0x98] sm:$0xff] }
 0x42e   :  { %v537_v32 = vrot.slane %v518_v28, 4  ;;  %v538_v33 = vrot.slane %v524_v29, 4  ;;  %v525_v34 = vsel %vm181_vm4, %v517_v30, %v505_v19  ;;  %v519_v36 = vsel %vm181_vm4, %v513_v17, %v517_v30  ;;  %v1048_v17 = vld [vmem:[#allocation7 + $0x18] sm:$0xff]  ;;  %v1095_v19 = vld [vmem:[#allocation7 + $0x190] sm:$0xff]  ;;  %v1065_v29 = vld [vmem:[#allocation7 + $0xa0] sm:$0xff] }
 0x42f   :  { %585 = vmatpush1.msra.mxu1 %v540_v26  ;;  %v545_v37 = vrot.slane %v525_v34, 4  ;;  %v543_v43 = vrot.slane %v519_v36, 4  ;;  %v3075_v48 = vpack.c.bf16 %v1094_v44, %v1093_v10  ;;  %v3077_v40 = vpack.c.bf16 %v1078_v27, %v1077_v12  ;;  %v1079_v23 = vld [vmem:[#allocation7 + $0x110] sm:$0xff]  ;;  %v1080_v24 = vld [vmem:[#allocation7 + $0x118] sm:$0xff]  ;;  %v1066_v30 = vld [vmem:[#allocation7 + $0xa8] sm:$0xff] }
 0x430   :  { %v557_v35 = vsel %vm534_vm11, %v492_v61, %v537_v32  ;;  %2537 = vmatmul.mubr.msk.f32.vlgmr.msra.gmra.mrb[4].mxu1 %vm573_vm12, %v559_v31  ;;  %v558_v38 = vsel %vm534_vm11, %v493_v5, %v538_v33  ;;  %v1045_v5 = vld [vmem:[#allocation7] sm:$0xff]  ;;  %v3047_v15 = vpack.c.bf16 %v1064_v14, %v1063_v13  ;;  %v3049_v18 = vpack.c.bf16 %v1048_v17, %v1047_v16  ;;  %v1102_v14 = vld [vmem:[#allocation7 + $0x1c8] sm:$0xff] }
 0x431   :  { %v3039_v39 = vpack.c.bf16 %v558_v38, %v501_v8  ;;  %650 = vmatprep.mubr.f32.mxu1 %v3674_v51  ;;  %v3041_v41 = vpack.c.bf16 %v557_v35, %v500_v1  ;;  %v546_v45 = vsel %vm534_vm11, %v538_v33, %v545_v37  ;;  %v544_v46 = vsel %vm534_vm11, %v537_v32, %v543_v43  ;;  %v1049_v32 = vld [vmem:[#allocation7 + $0x20] sm:$0xff]  ;;  %v1050_v33 = vld [vmem:[#allocation7 + $0x28] sm:$0xff]  ;;  %v1067_v43 = vld [vmem:[#allocation7 + $0xb0] sm:$0xff] }
 0x432   :  { %v3043_v8 = vpack.c.bf16 %v1062_v4, %v1061_v3  ;;  %v3045_v11 = vpack.c.bf16 %v1046_v9, %v1045_v5  ;;  %v3079_v22 = vpack.c.bf16 %v1096_v20, %v1095_v19  ;;  %v3081_v28 = vpack.c.bf16 %v1080_v24, %v1079_v23  ;;  %v1097_v36 = vld [vmem:[#allocation7 + $0x1a0] sm:$0xff]  ;;  %v1098_v37 = vld [vmem:[#allocation7 + $0x1a8] sm:$0xff]  ;;  %v1071_v19 = vld [vmem:[#allocation7 + $0xd0] sm:$0xff] }
 0x433   :  { %3040 = vmatprep.subr.bf16.mxu1 %v3039_v39  ;;  %v3053_v35 = vpack.c.bf16 %v1050_v33, %v1049_v32  ;;  %v3083_v38 = vpack.c.bf16 %v1098_v37, %v1097_v36  ;;  %v1081_v39 = vld [vmem:[#allocation7 + $0x120] sm:$0xff]  ;;  %v1072_v20 = vld [vmem:[#allocation7 + $0xd8] sm:$0xff]  ;;  %v1103_v24 = vld [vmem:[#allocation7 + $0x1d0] sm:$0xff] }
 0x434   :  { %3042 = vmatpush1.bf16.msra.mxu1 %v3041_v41  ;;  %3044 = vmatprep.subr.bf16.mxu0 %v3043_v8  ;;  %v1082_v41 = vld [vmem:[#allocation7 + $0x128] sm:$0xff]  ;;  %v1069_v5 = vld [vmem:[#allocation7 + $0xc0] sm:$0xff] }
 0x435   :  { %2538 = vmatmul.mubr.msk.f32.gmra.mrb[6].mxu1 %vm573_vm12, %v560_v42  ;;  %661 = vmatprep.subr.mxu1 %v546_v45  ;;  %v1068_v45 = vld [vmem:[#allocation7 + $0xb8] sm:$0xff]  ;;  %v1070_v8 = vld [vmem:[#allocation7 + $0xc8] sm:$0xff]  ;;  %v1105_v36 = vld [vmem:[#allocation7 + $0x1e0] sm:$0xff] }
 0x436   :  { %721 = vmatprep.mubr.f32.mxu1 %v3674_v51  ;;  %3046 = vmatpush3.bf16.msra.mxu0 %v3045_v11  ;;  %v3059_v44 = vpack.c.bf16 %v1070_v8, %v1069_v5  ;;  %v1053_v11 = vld [vmem:[#allocation7 + $0x40] sm:$0xff]  ;;  %v1074_v32 = vld [vmem:[#allocation7 + $0xe8] sm:$0xff] }
 0x437   :  { %3048 = vmatprep.subr.bf16.mxu0 %v3047_v15  ;;  %v1106_v37 = vld [vmem:[#allocation7 + $0x1e8] sm:$0xff] }
 0x438   :  { %662 = vmatpush1.msra.mxu1 %v544_v46  ;;  %v3055_v46 = vpack.c.bf16 %v1068_v45, %v1067_v43  ;;  %v1075_v43 = vld [vmem:[#allocation7 + $0xf0] sm:$0xff]  ;;  %v1076_v45 = vld [vmem:[#allocation7 + $0xf8] sm:$0xff]  ;;  %v1126_v5 = vld [vmem:[#allocation7 + $0x288] sm:$0xff] }
 0x439   :  { %2539 = vmatmul.mubr.msk.f32.vlgmr.msra.gmra.mrb[8].mxu1 %vm573_vm12, %v559_v31  ;;  %3076 = vmatprep.subr.bf16.mxu1 %v3075_v48  ;;  %v3051_v31 = vpack.c.bf16 %v1066_v30, %v1065_v29  ;;  %v1054_v48 = vld [vmem:[#allocation7 + $0x48] sm:$0xff]  ;;  %v1087_v29 = vld [vmem:[#allocation7 + $0x150] sm:$0xff]  ;;  %v1088_v30 = vld [vmem:[#allocation7 + $0x158] sm:$0xff] }
 0x43a   :  { %727 = vmatprep.mubr.f32.mxu1 %v3674_v51  ;;  %3078 = vmatpush3.bf16.msra.mxu1 %v3077_v40  ;;  %v3061_v13 = vpack.c.bf16 %v1054_v48, %v1053_v11  ;;  %v1101_v40 = vld [vmem:[#allocation7 + $0x1c0] sm:$0xff]  ;;  %v1158_v48 = vld [vmem:[#allocation7 + $0x388] sm:$0xff] }
 0x43b   :  { %3050 = vmatpush3.bf16.msra.mxu0 %v3049_v18  ;;  %3080 = vmatprep.subr.bf16.mxu1 %v3079_v22  ;;  %v3091_v17 = vpack.c.bf16 %v1102_v14, %v1101_v40  ;;  %v1085_v18 = vld [vmem:[#allocation7 + $0x140] sm:$0xff]  ;;  %v1055_v22 = vld [vmem:[#allocation7 + $0x50] sm:$0xff] }
 0x43c   :  { %3052 = vmatprep.subr.bf16.mxu0 %v3051_v31  ;;  %v1073_v31 = vld [vmem:[#allocation7 + $0xe0] sm:$0xff] }
 0x43d   :  { %2540 = vmatmul.mubr.msk.f32.gmra.mrb[10].mxu1 %vm573_vm12, %v560_v42  ;;  %v566_v47 = vpop.permute.xlu0 %565  ;;  %v3085_v42 = vpack.c.bf16 %v1082_v41, %v1081_v39  ;;  %v3067_v33 = vpack.c.bf16 %v1074_v32, %v1073_v31  ;;  %v1089_v39 = vld [vmem:[#allocation7 + $0x160] sm:$0xff]  ;;  %v1090_v41 = vld [vmem:[#allocation7 + $0x168] sm:$0xff] }
 0x43e   :  { %3082 = vmatpush3.bf16.msra.mxu1 %v3081_v28  ;;  %v1157_v11 = vld [vmem:[#allocation7 + $0x380] sm:$0xff] }
 0x43f   :  { %3054 = vmatpush3.bf16.msra.mxu0 %v3053_v35  ;;  %3084 = vmatprep.subr.bf16.mxu1 %v3083_v38  ;;  %v3099_v38 = vpack.c.bf16 %v1106_v37, %v1105_v36 }
 0x440   :  { %3056 = vmatprep.subr.bf16.mxu0 %v3055_v46  ;;  %v3071_v46 = vpack.c.bf16 %v1076_v45, %v1075_v43 }
 0x442   :  { %3086 = vmatpush3.bf16.msra.mxu1 %v3085_v42  ;;  %v3101_v42 = vpack.c.bf16 %v1090_v41, %v1089_v39 }
 0x503   :  { %v646_v49 = vpop.f32.mrb[4].mxu1 }
 0x504   :  { %v647_v50 = vadd.f32 %v646_v49, %v566_v47  ;;  %v648_v52 = vpop.f32.mrb[5].mxu1  ;;  %v1052_v49 = vld [vmem:[#allocation7 + $0x38] sm:$0xff] }
 0x505   :  { %v4031_v53 = vadd.f32 %v648_v52, %v566_v47  ;;  %v1099_v52 = vld [vmem:[#allocation7 + $0x1b0] sm:$0xff] }
 0x506   :  { %v734_v54 = vmax.f32 %v647_v50, 0.0 }
 0x507   :  { %v735_v55 = vmax.f32 %v4031_v53, 0.0  ;;  %v1086_v53 = vld [vmem:[#allocation7 + $0x148] sm:$0xff] }
 0x508   :  { %742 = vrot.lane.b32.xlu1 %v734_v54, %s3672_s0  ;;  %v4035_v56 = vpop.f32.mrb[6].mxu1 }
 0x509   :  { %746 = vrot.lane.b32.xlu0 %v735_v55, %s3672_s0  ;;  %v4040_v57 = vpop.f32.mrb[7].mxu1 }
 0x50c   :  { %v723_v58 = vpop.f32.mrb[8].mxu1 }
 0x50d   :  { %v4042_v59 = vadd.f32 %v723_v58, %v566_v47  ;;  %v725_v60 = vpop.f32.mrb[9].mxu1 }
 0x50e   :  { %v4044_v61 = vadd.f32 %v725_v60, %v566_v47  ;;  %v1051_v47 = vld [vmem:[#allocation7 + $0x30] sm:$0xff] }
 0x50f   :  { %v736_v62 = vmax.f32 %v4042_v59, 0.0  ;;  %v3057_v50 = vpack.c.bf16 %v1052_v49, %v1051_v47  ;;  %v1083_v60 = vld [vmem:[#allocation7 + $0x130] sm:$0xff]  ;;  %v1056_v59 = vld [vmem:[#allocation7 + $0x58] sm:$0xff] }
 0x510   :  { %v737_v63 = vmax.f32 %v4044_v61, 0.0  ;;  %v4057_v1 = vpop.f32.mrb[10].mxu1  ;;  %v3065_v23 = vpack.c.bf16 %v1056_v59, %v1055_v22  ;;  %v1057_v61 = vld [vmem:[#allocation7 + $0x60] sm:$0xff]  ;;  %v1059_v47 = vld [vmem:[#allocation7 + $0x70] sm:$0xff]  ;;  %v1060_v49 = vld [vmem:[#allocation7 + $0x78] sm:$0xff] }
 0x511   :  { %750 = vrot.lane.b32.xlu1 %v736_v62, %s3672_s0  ;;  %v4059_v2 = vpop.f32.mrb[11].mxu1  ;;  %3058 = vmatpush3.bf16.msra.mxu0 %v3057_v50  ;;  %v3073_v50 = vpack.c.bf16 %v1060_v49, %v1059_v47  ;;  %v3678_v47 = vmov 1983009808  }
 0x512   :  { %754 = vrot.lane.b32.xlu0 %v737_v63, %s3672_s0  ;;  %3060 = vmatprep.subr.bf16.mxu0 %v3059_v44  ;;  %v1444_v49 = vunpack.c.l.s4 %v3678_v47 }
 0x515   :  { %570 = vperm.xlu1 %3530, %v562_v0   ;;  %v1084_v0 = vld [vmem:[#allocation7 + $0x138] sm:$0xff]  ;;  %3062 = vmatpush3.bf16.msra.mxu0 %v3061_v13 }
 0x516   :  { %v3089_v4 = vpack.c.bf16 %v1084_v0, %v1083_v60  ;;  %v1091_v60 = vld [vmem:[#allocation7 + $0x170] sm:$0xff]  ;;  %v1092_v0 = vld [vmem:[#allocation7 + $0x178] sm:$0xff] }
 0x57a   :  { %v743_v21 = vpop.permute.xlu1 %742 }
 0x57b   :  { %v747_v25 = vpop.permute.xlu0 %746 }
 0x57c   :  { %v762_v26 = vsel %vm181_vm4, %v743_v21, %v747_v25 }
 0x57d   :  { %v4063_v34 = vmax.f32 %v734_v54, %v762_v26  ;;  %v1100_v54 = vld [vmem:[#allocation7 + $0x1b8] sm:$0xff]  ;;  %v3097_v26 = vpack.c.bf16 %v1088_v30, %v1087_v29 }
 0x57e   :  { %v3087_v58 = vpack.c.bf16 %v1100_v54, %v1099_v52  ;;  %v1107_v52 = vld [vmem:[#allocation7 + $0x1f0] sm:$0xff]  ;;  %v1108_v54 = vld [vmem:[#allocation7 + $0x1f8] sm:$0xff] }
 0x57f   :  { %774 = vrot.lane.b32.xlu0 %v4063_v34, %s3671_s8 }
 0x580   :  { %3088 = vmatprep.subr.bf16.mxu1 %v3087_v58  ;;  %v3103_v58 = vpack.c.bf16 %v1108_v54, %v1107_v52 }
 0x581   :  { %3090 = vmatpush3.bf16.msra.mxu1 %v3089_v4  ;;  %v1125_v4 = vld [vmem:[#allocation7 + $0x280] sm:$0xff] }
 0x582   :  { %3092 = vmatprep.subr.bf16.mxu1 %v3091_v17 }
 0x583   :  { %v751_v3 = vpop.permute.xlu1 %750 }
 0x584   :  { %v760_v9 = vsel %vm181_vm4, %v747_v25, %v751_v3  ;;  %v755_v10 = vpop.permute.xlu0 %754  ;;  %v1104_v25 = vld [vmem:[#allocation7 + $0x1d8] sm:$0xff] }
 0x585   :  { %v4071_v12 = vmax.f32 %v735_v55, %v760_v9  ;;  %v758_v27 = vsel %vm181_vm4, %v751_v3, %v755_v10  ;;  %v764_v15 = vsel %vm181_vm4, %v755_v10, %v743_v21  ;;  %v3093_v55 = vpack.c.bf16 %v1086_v53, %v1085_v18 }
 0x586   :  { %v4079_v16 = vmax.f32 %v736_v62, %v758_v27  ;;  %v3063_v21 = vpack.c.bf16 %v1072_v20, %v1071_v19  ;;  %v4087_v62 = vmax.f32 %v737_v63, %v764_v15  ;;  %v3095_v28 = vpack.c.bf16 %v1104_v25, %v1103_v24  ;;  %v1058_v63 = vld [vmem:[#allocation7 + $0x68] sm:$0xff] }
 0x587   :  { %778 = vrot.lane.b32.xlu1 %v4071_v12, %s3671_s8  ;;  %3094 = vmatpush3.bf16.msra.mxu1 %v3093_v55  ;;  %v3069_v35 = vpack.c.bf16 %v1058_v63, %v1057_v61  ;;  %v3105_v3 = vpack.c.bf16 %v1092_v0, %v1091_v60  ;;  %v3107_v9 = vpack.c.bf16 %v1126_v5, %v1125_v4  ;;  %v4120_v53 = vshrl.u32 %v111_v6, 7 }
 0x588   :  { %782 = vrot.lane.b32.xlu0 %v4079_v16, %s3671_s8  ;;  %3064 = vmatprep.subr.bf16.mxu0 %v3063_v21  ;;  %v3139_v15 = vpack.c.bf16 %v1158_v48, %v1157_v11  ;;  %v1445_v5 = vunpack.c.0.s8 %v1444_v49  ;;  %v1131_v49 = vld [vmem:[#allocation7 + $0x2b0] sm:$0xff] }
 0x589   :  { %3066 = vmatpush3.bf16.msra.mxu0 %v3065_v23  ;;  %3096 = vmatprep.subr.bf16.mxu1 %v3095_v28 }
 0x58a   :  { %3068 = vmatprep.subr.bf16.mxu0 %v3067_v33 }
 0x58b   :  { %786 = vrot.lane.b32.xlu1 %v4087_v62, %s3671_s8  ;;  %3098 = vmatpush3.bf16.msra.mxu1 %v3097_v26 }
 0x58c   :  { %3100 = vmatprep.subr.bf16.mxu1 %v3099_v38 }
 0x58d   :  { %3070 = vmatpush3.bf16.msra.mxu0 %v3069_v35 }
 0x58e   :  { %3072 = vmatprep.subr.bf16.mxu0 %v3071_v46 }
 0x58f   :  { %3102 = vmatpush3.bf16.msra.mxu1 %v3101_v42 }
 0x590   :  { %3104 = vmatprep.subr.bf16.mxu1 %v3103_v58 }
 0x591   :  { %3074 = vmatpush3.bf16.msra.mxu0 %v3073_v50 }
 0x592   :  { %3108 = vmatprep.subr.bf16.mxu0 %v3107_v9 }
 0x593   :  { %3106 = vmatpush3.bf16.msra.mxu1 %v3105_v3 }
 0x594   :  { %v571_v8 = vpop.permute.xlu1 %570  ;;  %3140 = vmatprep.subr.bf16.mxu1 %v3139_v15  ;;  %v4193_v15 = vsub.s32 %v1445_v5, %v4120_v53  ;;  %v1115_v5 = vld [vmem:[#allocation7 + $0x230] sm:$0xff] }
 0x595   :  { %v4092_v10 = vadd.f32 %v4040_v57, %v571_v8  ;;  %v4095_v44 = vadd.f32 %v4035_v56, %v571_v8  ;;  %v4098_v27 = vadd.f32 %v4057_v1, %v571_v8  ;;  %v4101_v13 = vadd.f32 %v4059_v2, %v571_v8 }
 0x596   :  { %v3677_v1 = vmov 1966171168  }
 0x597   :  { %v739_v40 = vmax.f32 %v4092_v10, 0.0  ;;  %v738_v14 = vmax.f32 %v4095_v44, 0.0  ;;  %v740_v56 = vmax.f32 %v4098_v27, 0.0  ;;  %v741_v57 = vmax.f32 %v4101_v13, 0.0  ;;  %v1142_v27 = vld [vmem:[#allocation7 + $0x308] sm:$0xff] }
 0x598   :  { %v810_v2 = vunpack.c.l.s4 %v3677_v1 }
 0x599   :  { %748 = vrot.lane.b32.xlu1 %v739_v40, %s3672_s0  ;;  %744 = vrot.lane.b32.xlu0 %v738_v14, %s3672_s0 }
 0x59a   :  { %v811_v18 = vunpack.c.0.s8 %v810_v2 }
 0x59c   :  { %v4128_v59 = vsub.s32 %v811_v18, %v4120_v53 }
 0x59d   :  { %756 = vrot.lane.b32.xlu1 %v741_v57, %s3672_s0  ;;  %752 = vrot.lane.b32.xlu0 %v740_v56, %s3672_s0 }
 0x5f1   :  { %v775_v17 = vpop.permute.xlu0 %774 }
 0x5f9   :  { %v779_v55 = vpop.permute.xlu1 %778 }
 0x5fa   :  { %v794_v19 = vsel %vm113_vm0, %v775_v17, %v779_v55  ;;  %v783_v20 = vpop.permute.xlu0 %782 }
 0x5fb   :  { %v798_v21 = vmax.f32 %v4063_v34, %v794_v19  ;;  %v792_v22 = vsel %vm113_vm0, %v779_v55, %v783_v20  ;;  %v1109_v19 = vld [vmem:[#allocation7 + $0x200] sm:$0xff] }
 0x5fc   :  { %v799_v23 = vmax.f32 %v4071_v12, %v792_v22 }
 0x5fd   :  { %v787_v24 = vpop.permute.xlu1 %786 }
 0x5fe   :  { %v808_v25 = vcombine.low %v798_v21, %v799_v23  ;;  %v848_v28 = vcombine.high %v798_v21, %v799_v23  ;;  %v790_v29 = vsel %vm113_vm0, %v783_v20, %v787_v24  ;;  %v796_v30 = vsel %vm113_vm0, %v787_v24, %v775_v17  ;;  %v1110_v20 = vld [vmem:[#allocation7 + $0x208] sm:$0xff]  ;;  %v1141_v23 = vld [vmem:[#allocation7 + $0x300] sm:$0xff]  ;;  %v1128_v24 = vld [vmem:[#allocation7 + $0x298] sm:$0xff] }
 0x5ff   :  { %v800_v26 = vmax.f32 %v4079_v16, %v790_v29  ;;  %v801_v34 = vmax.f32 %v4087_v62, %v796_v30  ;;  %v3109_v30 = vpack.c.bf16 %v1110_v20, %v1109_v19  ;;  %v1166_v19 = vld [vmem:[#allocation7 + $0x3c8] sm:$0xff] }
 0x600   :  { %v815_v31 = vrot.slane %v808_v25, %v4128_v59  ;;  %v855_v32 = vrot.slane %v848_v28, %v4128_v59 }
 0x601   :  { %v926_v33 = vcombine.low %v800_v26, %v801_v34  ;;  %v963_v61 = vcombine.high %v800_v26, %v801_v34  ;;  %v1159_v26 = vld [vmem:[#allocation7 + $0x390] sm:$0xff]  ;;  %v1160_v34 = vld [vmem:[#allocation7 + $0x398] sm:$0xff] }
 0x602   :  { %v822_v63 = vrot.slane %v815_v31, %v4128_v59  ;;  %v829_v35 = vcombine.high %v815_v31, %v815_v31  ;;  %v862_v36 = vrot.slane %v855_v32, %v4128_v59  ;;  %v866_v37 = vcombine.high %v855_v32, %v855_v32 }
 0x603   :  { %v933_v16 = vrot.slane %v926_v33, %v4128_v59  ;;  %v970_v62 = vrot.slane %v963_v61, %v4128_v59  ;;  %v1111_v61 = vld [vmem:[#allocation7 + $0x210] sm:$0xff] }
 0x604   :  { %828 = vst.msk [vmem:[#allocation2] ss:$2 sm:$0x3] %vm4140_vm13, %v822_v63  ;;  %v836_v6 = vrot.slane %v829_v35, %v4128_v59  ;;  %v840_v38 = vcombine.high %v822_v63, %v822_v63  ;;  %865 = vst.msk [vmem:[#allocation2 + $0x10] ss:$2 sm:$0x3] %vm4140_vm13, %v862_v36  ;;  %v873_v39 = vrot.slane %v866_v37, %v4128_v59 }
 0x605   :  { %v877_v41 = vcombine.high %v862_v36, %v862_v36  ;;  %v940_v42 = vrot.slane %v933_v16, %v4128_v59  ;;  %v944_v43 = vcombine.high %v933_v16, %v933_v16  ;;  %v977_v45 = vrot.slane %v970_v62, %v4128_v59  ;;  %v1112_v63 = vld [vmem:[#allocation7 + $0x218] sm:$0xff]  ;;  %v1129_v37 = vld [vmem:[#allocation7 + $0x2a0] sm:$0xff]  ;;  %v1130_v16 = vld [vmem:[#allocation7 + $0x2a8] sm:$0xff] }
 0x606   :  { %v981_v46 = vcombine.high %v970_v62, %v970_v62  ;;  %839 = vst.msk [vmem:[#allocation2 + $0x4] ss:$2 sm:$0x3] %vm4140_vm13, %v836_v6  ;;  %843 = vst.msk [vmem:[#allocation2 + $0x8] ss:$2 sm:$0x3] %vm4140_vm13, %v840_v38  ;;  %v844_v50 = vcombine.high %v836_v6, %v836_v6  ;;  %v881_v52 = vcombine.high %v873_v39, %v873_v39 }
 0x607   :  { %876 = vst.msk [vmem:[#allocation2 + $0x14] ss:$2 sm:$0x3] %vm4140_vm13, %v873_v39  ;;  %880 = vst.msk [vmem:[#allocation2 + $0x18] ss:$2 sm:$0x3] %vm4140_vm13, %v877_v41  ;;  %v951_v54 = vrot.slane %v944_v43, %v4128_v59  ;;  %v955_v58 = vcombine.high %v940_v42, %v940_v42  ;;  %v992_v0 = vcombine.high %v977_v45, %v977_v45 }
 0x608   :  { %943 = vst.msk [vmem:[#allocation2 + $0x1] ss:$2 sm:$0x3] %vm4140_vm13, %v940_v42  ;;  %980 = vst.msk [vmem:[#allocation2 + $0x11] ss:$2 sm:$0x3] %vm4140_vm13, %v977_v45  ;;  %v988_v60 = vrot.slane %v981_v46, %v4128_v59  ;;  %v3141_v35 = vpack.c.bf16 %v1142_v27, %v1141_v23  ;;  %v3143_v38 = vpack.c.bf16 %v1160_v34, %v1159_v26 }
 0x609   :  { %847 = vst.msk [vmem:[#allocation2 + $0xc] ss:$2 sm:$0x3] %vm4140_vm13, %v844_v50  ;;  %884 = vst.msk [vmem:[#allocation2 + $0x1c] ss:$2 sm:$0x3] %vm4140_vm13, %v881_v52  ;;  %v959_v3 = vcombine.high %v951_v54, %v951_v54  ;;  %v3113_v42 = vpack.c.bf16 %v1112_v63, %v1111_v61  ;;  %v3115_v13 = vpack.c.bf16 %v1130_v16, %v1129_v37 }
 0x60a   :  { %954 = vst.msk [vmem:[#allocation2 + $0x5] ss:$2 sm:$0x3] %vm4140_vm13, %v951_v54  ;;  %958 = vst.msk [vmem:[#allocation2 + $0x9] ss:$2 sm:$0x3] %vm4140_vm13, %v955_v58  ;;  %v996_v4 = vcombine.high %v988_v60, %v988_v60 }
 0x60b   :  { %991 = vst.msk [vmem:[#allocation2 + $0x15] ss:$2 sm:$0x3] %vm4140_vm13, %v988_v60  ;;  %995 = vst.msk [vmem:[#allocation2 + $0x19] ss:$2 sm:$0x3] %vm4140_vm13, %v992_v0  ;;  %v745_v8 = vpop.permute.xlu0 %744  ;;  %v749_v9 = vpop.permute.xlu1 %748 }
 0x60c   :  { %962 = vst.msk [vmem:[#allocation2 + $0xd] ss:$2 sm:$0x3] %vm4140_vm13, %v959_v3  ;;  %999 = vst.msk [vmem:[#allocation2 + $0x1d] ss:$2 sm:$0x3] %vm4140_vm13, %v996_v4  ;;  %v763_v11 = vsel %vm181_vm4, %v745_v8, %v749_v9 }
 0x60d   :  { %v4190_v48 = vmax.f32 %v738_v14, %v763_v11  ;;  %v1143_v39 = vld [vmem:[#allocation7 + $0x310] sm:$0xff]  ;;  %v1144_v41 = vld [vmem:[#allocation7 + $0x318] sm:$0xff]  ;;  %v1161_v43 = vld [vmem:[#allocation7 + $0x3a0] sm:$0xff] }
 0x60e   :  { %v1162_v45 = vld [vmem:[#allocation7 + $0x3a8] sm:$0xff]  ;;  %v3145_v47 = vpack.c.bf16 %v1144_v41, %v1143_v39  ;;  %v1132_v50 = vld [vmem:[#allocation7 + $0x2b8] sm:$0xff]  ;;  %v1145_v54 = vld [vmem:[#allocation7 + $0x320] sm:$0xff] }
 0x60f   :  { %v753_v1 = vpop.permute.xlu0 %752  ;;  %776 = vrot.lane.b32.xlu0 %v4190_v48, %s3671_s8  ;;  %v757_v2 = vpop.permute.xlu1 %756  ;;  %v1114_v46 = vld [vmem:[#allocation7 + $0x228] sm:$0xff]  ;;  %v3147_v52 = vpack.c.bf16 %v1162_v45, %v1161_v43  ;;  %v1163_v0 = vld [vmem:[#allocation7 + $0x3b0] sm:$0xff]  ;;  %v1164_v3 = vld [vmem:[#allocation7 + $0x3b8] sm:$0xff]  ;;  %v3119_v4 = vpack.c.bf16 %v1132_v50, %v1131_v49 }
 0x610   :  { %v761_v17 = vsel %vm181_vm4, %v749_v9, %v753_v1  ;;  %v759_v18 = vsel %vm181_vm4, %v753_v1, %v757_v2  ;;  %v765_v28 = vsel %vm181_vm4, %v757_v2, %v745_v8  ;;  %v1146_v58 = vld [vmem:[#allocation7 + $0x328] sm:$0xff]  ;;  %v1116_v8 = vld [vmem:[#allocation7 + $0x238] sm:$0xff]  ;;  %v1133_v11 = vld [vmem:[#allocation7 + $0x2c0] sm:$0xff]  ;;  %v3151_v2 = vpack.c.bf16 %v1164_v3, %v1163_v0 }
 0x611   :  { %v1039_v55 = vld [vmem:[#allocation2] sm:$0xff]  ;;  %v4203_v44 = vmax.f32 %v739_v40, %v761_v17  ;;  %v4207_v14 = vmax.f32 %v740_v56, %v759_v18  ;;  %v1127_v56 = vld [vmem:[#allocation7 + $0x290] sm:$0xff]  ;;  %v4227_v62 = vmax.f32 %v741_v57, %v765_v28  ;;  %v1113_v57 = vld [vmem:[#allocation7 + $0x220] sm:$0xff]  ;;  %v3149_v9 = vpack.c.bf16 %v1146_v58, %v1145_v54 }
 0x612   :  { %v1442_v53 = vcombine.high %v1039_v55, %v1039_v55  ;;  %v1449_v21 = vrot.slane %v1039_v55, %v4193_v15  ;;  %v3111_v36 = vpack.c.bf16 %v1128_v24, %v1127_v56  ;;  %v3117_v60 = vpack.c.bf16 %v1114_v46, %v1113_v57  ;;  %v1134_v1 = vld [vmem:[#allocation7 + $0x2c8] sm:$0xff]  ;;  %v1147_v17 = vld [vmem:[#allocation7 + $0x330] sm:$0xff]  ;;  %v1148_v18 = vld [vmem:[#allocation7 + $0x338] sm:$0xff] }
 0x613   :  { %v1040_v22 = vld [vmem:[#allocation2 + $0x8] sm:$0xff]  ;;  %780 = vrot.lane.b32.xlu1 %v4203_v44, %s3671_s8  ;;  %784 = vrot.lane.b32.xlu0 %v4207_v14, %s3671_s8  ;;  %v3121_v55 = vpack.c.bf16 %v1116_v8, %v1115_v5  ;;  %v3123_v20 = vpack.c.bf16 %v1134_v1, %v1133_v11  ;;  %v3153_v23 = vpack.c.bf16 %v1148_v18, %v1147_v17  ;;  %v1136_v27 = vld [vmem:[#allocation7 + $0x2d8] sm:$0xff]  ;;  %v1119_v34 = vld [vmem:[#allocation7 + $0x250] sm:$0xff] }
 0x614   :  { %v1456_v10 = vrot.slane %v1442_v53, %v4193_v15  ;;  %v4216_v40 = vrot.slane %v1040_v22, %v4193_v15  ;;  %v1459_v25 = vcombine.high %v1040_v22, %v1040_v22  ;;  %v1457_v29 = vcombine.high %v1449_v21, %v1449_v21  ;;  %v1165_v53 = vld [vmem:[#allocation7 + $0x3c0] sm:$0xff]  ;;  %v1118_v22 = vld [vmem:[#allocation7 + $0x248] sm:$0xff]  ;;  %v1152_v37 = vld [vmem:[#allocation7 + $0x358] sm:$0xff] }
 0x615   :  { %v3155_v56 = vpack.c.bf16 %v1166_v19, %v1165_v53  ;;  %v1149_v24 = vld [vmem:[#allocation7 + $0x340] sm:$0xff]  ;;  %v1138_v63 = vld [vmem:[#allocation7 + $0x2e8] sm:$0xff]  ;;  %v1139_v45 = vld [vmem:[#allocation7 + $0x2f0] sm:$0xff] }
 0x616   :  { %v1458_v31 = vcombine.high %v1456_v10, %v1456_v10  ;;  %v1474_v32 = vcombine.high %v4216_v40, %v4216_v40  ;;  %v4223_v33 = vrot.slane %v1459_v25, %v4193_v15  ;;  %1632 = vmatprep.mubr.f32.mxu0 %v1457_v29  ;;  %v1150_v25 = vld [vmem:[#allocation7 + $0x348] sm:$0xff]  ;;  %v1167_v29 = vld [vmem:[#allocation7 + $0x3d0] sm:$0xff]  ;;  %v1137_v61 = vld [vmem:[#allocation7 + $0x2e0] sm:$0xff] }
 0x617   :  { %1633 = vmatmul.mubr.f32.vlgmr.msra.gmra.mrb[0].mxu0 %v1449_v21  ;;  %788 = vrot.lane.b32.xlu1 %v4227_v62, %s3671_s8  ;;  %v1117_v21 = vld [vmem:[#allocation7 + $0x240] sm:$0xff]  ;;  %v3131_v39 = vpack.c.bf16 %v1138_v63, %v1137_v61  ;;  %v1171_v50 = vld [vmem:[#allocation7 + $0x3f0] sm:$0xff]  ;;  %v1041_v0 = vld [vmem:[#allocation2 + $0x10] sm:$0xff] }
 0x618   :  { %1702 = vmatprep.mubr.f32.mxu1 %v1458_v31  ;;  %v1475_v6 = vcombine.high %v4223_v33, %v4223_v33  ;;  %3110 = vmatpush3.bf16.msra.mxu0 %v3109_v30  ;;  %v3125_v28 = vpack.c.bf16 %v1118_v22, %v1117_v21  ;;  %v1168_v30 = vld [vmem:[#allocation7 + $0x3d8] sm:$0xff]  ;;  %v1121_v41 = vld [vmem:[#allocation7 + $0x260] sm:$0xff]  ;;  %v1123_v58 = vld [vmem:[#allocation7 + $0x270] sm:$0xff]  ;;  %v1476_v18 = vcombine.high %v1041_v0, %v1041_v0 }
 0x619   :  { %1772 = vmatprep.mubr.f32.mxu0 %v1474_v32  ;;  %1703 = vmatmul.mubr.f32.vlgmr.msra.gmra.mrb[12].mxu1 %v1456_v10  ;;  %v1135_v10 = vld [vmem:[#allocation7 + $0x2d0] sm:$0xff]  ;;  %v1120_v31 = vld [vmem:[#allocation7 + $0x258] sm:$0xff]  ;;  %v3157_v32 = vpack.c.bf16 %v1150_v25, %v1149_v24  ;;  %v1153_v46 = vld [vmem:[#allocation7 + $0x360] sm:$0xff]  ;;  %v4234_v21 = vrot.slane %v1041_v0, %v4193_v15 }
 0x61a   :  { %3142 = vmatpush3.bf16.msra.mxu1 %v3141_v35  ;;  %3112 = vmatprep.subr.bf16.mxu0 %v3111_v36  ;;  %v3127_v26 = vpack.c.bf16 %v1136_v27, %v1135_v10  ;;  %v3159_v35 = vpack.c.bf16 %v1168_v30, %v1167_v29  ;;  %v1151_v36 = vld [vmem:[#allocation7 + $0x350] sm:$0xff]  ;;  %v3129_v16 = vpack.c.bf16 %v1120_v31, %v1119_v34  ;;  %v1190_v5 = vld [vmem:[#allocation7 + $0x488] sm:$0xff]  ;;  %v1156_v11 = vld [vmem:[#allocation7 + $0x378] sm:$0xff] }
 0x61b   :  { %1842 = vmatprep.mubr.f32.mxu1 %v1475_v6  ;;  %3144 = vmatprep.subr.bf16.mxu1 %v3143_v38  ;;  %v1169_v6 = vld [vmem:[#allocation7 + $0x3e0] sm:$0xff]  ;;  %v1170_v38 = vld [vmem:[#allocation7 + $0x3e8] sm:$0xff]  ;;  %v3161_v43 = vpack.c.bf16 %v1152_v37, %v1151_v36  ;;  %v1191_v22 = vld [vmem:[#allocation7 + $0x490] sm:$0xff]  ;;  %v4237_v25 = vrot.slane %v1476_v18, %v4193_v15  ;;  %v1491_v31 = vcombine.high %v4234_v21, %v4234_v21 }
 0x61c   :  { %3114 = vmatpush3.bf16.msra.mxu0 %v3113_v42  ;;  %v1122_v42 = vld [vmem:[#allocation7 + $0x268] sm:$0xff]  ;;  %v3163_v57 = vpack.c.bf16 %v1170_v38, %v1169_v6  ;;  %v1173_v53 = vld [vmem:[#allocation7 + $0x400] sm:$0xff]  ;;  %v1224_v29 = vld [vmem:[#allocation7 + $0x598] sm:$0xff] }
 0x61d   :  { %3116 = vmatprep.subr.bf16.mxu0 %v3115_v13  ;;  %v1140_v13 = vld [vmem:[#allocation7 + $0x2f8] sm:$0xff]  ;;  %v3133_v49 = vpack.c.bf16 %v1122_v42, %v1121_v41  ;;  %v1222_v17 = vld [vmem:[#allocation7 + $0x588] sm:$0xff]  ;;  %v1205_v27 = vld [vmem:[#allocation7 + $0x500] sm:$0xff] }
 0x61e   :  { %3146 = vmatpush3.bf16.msra.mxu1 %v3145_v47  ;;  %v1154_v47 = vld [vmem:[#allocation7 + $0x368] sm:$0xff]  ;;  %v3135_v54 = vpack.c.bf16 %v1140_v13, %v1139_v45  ;;  %v1176_v34 = vld [vmem:[#allocation7 + $0x418] sm:$0xff]  ;;  %v1193_v61 = vld [vmem:[#allocation7 + $0x4a0] sm:$0xff] }
 0x61f   :  { %3148 = vmatprep.subr.bf16.mxu1 %v3147_v52  ;;  %v1172_v52 = vld [vmem:[#allocation7 + $0x3f8] sm:$0xff]  ;;  %v3165_v3 = vpack.c.bf16 %v1154_v47, %v1153_v46  ;;  %v1174_v19 = vld [vmem:[#allocation7 + $0x408] sm:$0xff]  ;;  %v1207_v36 = vld [vmem:[#allocation7 + $0x510] sm:$0xff] }
 0x620   :  { %3118 = vmatpush3.bf16.msra.mxu0 %v3117_v60  ;;  %v1124_v60 = vld [vmem:[#allocation7 + $0x278] sm:$0xff]  ;;  %v3167_v8 = vpack.c.bf16 %v1172_v52, %v1171_v50  ;;  %v3173_v24 = vpack.c.bf16 %v1174_v19, %v1173_v53  ;;  %v1194_v63 = vld [vmem:[#allocation7 + $0x4a8] sm:$0xff]  ;;  %v1225_v38 = vld [vmem:[#allocation7 + $0x5a0] sm:$0xff] }
 0x621   :  { %3120 = vmatprep.subr.bf16.mxu0 %v3119_v4  ;;  %v1189_v4 = vld [vmem:[#allocation7 + $0x480] sm:$0xff]  ;;  %v3137_v1 = vpack.c.bf16 %v1124_v60, %v1123_v58  ;;  %v1208_v37 = vld [vmem:[#allocation7 + $0x518] sm:$0xff]  ;;  %v3179_v41 = vpack.c.bf16 %v1194_v63, %v1193_v61  ;;  %v1195_v45 = vld [vmem:[#allocation7 + $0x4b0] sm:$0xff] }
 0x622   :  { %3150 = vmatpush3.bf16.msra.mxu1 %v3149_v9  ;;  %v1155_v9 = vld [vmem:[#allocation7 + $0x370] sm:$0xff]  ;;  %v1177_v42 = vld [vmem:[#allocation7 + $0x420] sm:$0xff]  ;;  %v1196_v13 = vld [vmem:[#allocation7 + $0x4b8] sm:$0xff] }
 0x623   :  { %3152 = vmatprep.subr.bf16.mxu1 %v3151_v2  ;;  %v1221_v2 = vld [vmem:[#allocation7 + $0x580] sm:$0xff]  ;;  %v1210_v47 = vld [vmem:[#allocation7 + $0x528] sm:$0xff]  ;;  %v1227_v50 = vld [vmem:[#allocation7 + $0x5b0] sm:$0xff] }
 0x624   :  { %3122 = vmatpush3.bf16.msra.mxu0 %v3121_v55  ;;  %v3171_v55 = vpack.c.bf16 %v1190_v5, %v1189_v4  ;;  %v3203_v10 = vpack.c.bf16 %v1222_v17, %v1221_v2  ;;  %v1209_v46 = vld [vmem:[#allocation7 + $0x520] sm:$0xff]  ;;  %v1228_v52 = vld [vmem:[#allocation7 + $0x5b8] sm:$0xff]  ;;  %v1211_v5 = vld [vmem:[#allocation7 + $0x530] sm:$0xff] }
 0x625   :  { %3124 = vmatprep.subr.bf16.mxu0 %v3123_v20  ;;  %v3169_v20 = vpack.c.bf16 %v1156_v11, %v1155_v9  ;;  %v1180_v58 = vld [vmem:[#allocation7 + $0x438] sm:$0xff]  ;;  %v3213_v60 = vpack.c.bf16 %v1210_v47, %v1209_v46  ;;  %v1197_v0 = vld [vmem:[#allocation7 + $0x4c0] sm:$0xff]  ;;  %v3215_v4 = vpack.c.bf16 %v1228_v52, %v1227_v50  ;;  %v1182_v18 = vld [vmem:[#allocation7 + $0x448] sm:$0xff] }
 0x626   :  { %3154 = vmatpush3.bf16.msra.mxu1 %v3153_v23  ;;  %v1192_v23 = vld [vmem:[#allocation7 + $0x498] sm:$0xff]  ;;  %v1229_v11 = vld [vmem:[#allocation7 + $0x5c0] sm:$0xff]  ;;  %v1199_v53 = vld [vmem:[#allocation7 + $0x4d0] sm:$0xff] }
 0x627   :  { %3156 = vmatprep.subr.bf16.mxu1 %v3155_v56  ;;  %v1206_v56 = vld [vmem:[#allocation7 + $0x508] sm:$0xff]  ;;  %v3175_v30 = vpack.c.bf16 %v1192_v23, %v1191_v22  ;;  %v1181_v17 = vld [vmem:[#allocation7 + $0x440] sm:$0xff]  ;;  %v1200_v19 = vld [vmem:[#allocation7 + $0x4d8] sm:$0xff] }
 0x628   :  { %3126 = vmatpush3.bf16.msra.mxu0 %v3125_v28  ;;  %v1223_v28 = vld [vmem:[#allocation7 + $0x590] sm:$0xff]  ;;  %v1213_v22 = vld [vmem:[#allocation7 + $0x540] sm:$0xff]  ;;  %v1214_v23 = vld [vmem:[#allocation7 + $0x548] sm:$0xff] }
 0x629   :  { %3128 = vmatprep.subr.bf16.mxu0 %v3127_v26  ;;  %v1175_v26 = vld [vmem:[#allocation7 + $0x410] sm:$0xff]  ;;  %v1216_v61 = vld [vmem:[#allocation7 + $0x558] sm:$0xff] }
 0x62a   :  { %3158 = vmatpush3.bf16.msra.mxu1 %v3157_v32  ;;  %v3205_v32 = vpack.c.bf16 %v1206_v56, %v1205_v27  ;;  %v3177_v6 = vpack.c.bf16 %v1176_v34, %v1175_v26  ;;  %v1231_v27 = vld [vmem:[#allocation7 + $0x5d0] sm:$0xff]  ;;  %v1232_v56 = vld [vmem:[#allocation7 + $0x5d8] sm:$0xff]  ;;  %v1201_v26 = vld [vmem:[#allocation7 + $0x4e0] sm:$0xff] }
 0x62b   :  { %3160 = vmatprep.subr.bf16.mxu1 %v3159_v35  ;;  %v3207_v35 = vpack.c.bf16 %v1224_v29, %v1223_v28  ;;  %v1183_v28 = vld [vmem:[#allocation7 + $0x450] sm:$0xff]  ;;  %v1184_v29 = vld [vmem:[#allocation7 + $0x458] sm:$0xff]  ;;  %v1202_v34 = vld [vmem:[#allocation7 + $0x4e8] sm:$0xff] }
 0x62c   :  { %3130 = vmatpush3.bf16.msra.mxu0 %v3129_v16  ;;  %v1492_v16 = vcombine.high %v4237_v25, %v4237_v25  ;;  %v3193_v63 = vpack.c.bf16 %v1184_v29, %v1183_v28  ;;  %v1187_v47 = vld [vmem:[#allocation7 + $0x470] sm:$0xff]  ;;  %v1240_v28 = vld [vmem:[#allocation7 + $0x618] sm:$0xff] }
 0x62d   :  { %3132 = vmatprep.subr.bf16.mxu0 %v3131_v39  ;;  %v1226_v39 = vld [vmem:[#allocation7 + $0x5a8] sm:$0xff]  ;;  %v1042_v50 = vld [vmem:[#allocation2 + $0x18] sm:$0xff] }
 0x62e   :  { %3162 = vmatpush3.bf16.msra.mxu1 %v3161_v43  ;;  %v1178_v43 = vld [vmem:[#allocation7 + $0x428] sm:$0xff] }
 0x62f   :  { %3164 = vmatprep.subr.bf16.mxu1 %v3163_v57  ;;  %v3211_v57 = vpack.c.bf16 %v1226_v39, %v1225_v38  ;;  %v1203_v39 = vld [vmem:[#allocation7 + $0x4f0] sm:$0xff] }
 0x630   :  { %3134 = vmatpush3.bf16.msra.mxu0 %v3133_v49  ;;  %v3181_v49 = vpack.c.bf16 %v1178_v43, %v1177_v42  ;;  %v1217_v43 = vld [vmem:[#allocation7 + $0x560] sm:$0xff] }
 0x631   :  { %3136 = vmatprep.subr.bf16.mxu0 %v3135_v54  ;;  %v3183_v54 = vpack.c.bf16 %v1196_v13, %v1195_v45  ;;  %v1235_v13 = vld [vmem:[#allocation7 + $0x5f0] sm:$0xff] }
 0x632   :  { %3166 = vmatpush3.bf16.msra.mxu1 %v3165_v3  ;;  %v1198_v3 = vld [vmem:[#allocation7 + $0x4c8] sm:$0xff] }
 0x633   :  { %3168 = vmatprep.subr.bf16.mxu1 %v3167_v8  ;;  %v1212_v8 = vld [vmem:[#allocation7 + $0x538] sm:$0xff]  ;;  %v3187_v2 = vpack.c.bf16 %v1198_v3, %v1197_v0 }
 0x634   :  { %3138 = vmatpush3.bf16.msra.mxu0 %v3137_v1  ;;  %v1230_v1 = vld [vmem:[#allocation7 + $0x5c8] sm:$0xff]  ;;  %v1220_v0 = vld [vmem:[#allocation7 + $0x578] sm:$0xff] }
 0x635   :  { %3172 = vmatprep.subr.bf16.mxu0 %v3171_v55  ;;  %v3217_v55 = vpack.c.bf16 %v1212_v8, %v1211_v5  ;;  %v1286_v5 = vld [vmem:[#allocation7 + $0x788] sm:$0xff]  ;;  %v1493_v8 = vcombine.high %v1042_v50, %v1042_v50 }
 0x636   :  { %3170 = vmatpush3.bf16.msra.mxu1 %v3169_v20  ;;  %v3219_v20 = vpack.c.bf16 %v1230_v1, %v1229_v11  ;;  %v1237_v11 = vld [vmem:[#allocation7 + $0x600] sm:$0xff]  ;;  %v1238_v1 = vld [vmem:[#allocation7 + $0x608] sm:$0xff] }
 0x637   :  { %1773 = vmatmul.mubr.f32.vlgmr.msra.gmra.mrb[2].mxu0 %v4216_v40  ;;  %3204 = vmatprep.subr.bf16.mxu1 %v3203_v10  ;;  %v3209_v40 = vpack.c.bf16 %v1208_v37, %v1207_v36  ;;  %v3189_v10 = vpack.c.bf16 %v1182_v18, %v1181_v17  ;;  %v1234_v36 = vld [vmem:[#allocation7 + $0x5e8] sm:$0xff]  ;;  %v3195_v37 = vpack.c.bf16 %v1202_v34, %v1201_v26  ;;  %v1255_v18 = vld [vmem:[#allocation7 + $0x690] sm:$0xff]  ;;  %v1257_v26 = vld [vmem:[#allocation7 + $0x6a0] sm:$0xff] }
 0x638   :  { %3174 = vmatpush3.bf16.msra.mxu0 %v3173_v24  ;;  %1912 = vmatprep.mubr.f32.mxu0 %v1491_v31  ;;  %v3191_v24 = vpack.c.bf16 %v1200_v19, %v1199_v53  ;;  %v3223_v31 = vpack.c.bf16 %v1232_v56, %v1231_v27  ;;  %v4246_v17 = vrot.slane %v1042_v50, %v4193_v15  ;;  %v1269_v19 = vld [vmem:[#allocation7 + $0x700] sm:$0xff]  ;;  %v1288_v27 = vld [vmem:[#allocation7 + $0x798] sm:$0xff]  ;;  %v1258_v34 = vld [vmem:[#allocation7 + $0x6a8] sm:$0xff] }
 0x639   :  { %1843 = vmatmul.mubr.f32.vlgmr.msra.gmra.mrb[14].mxu1 %v4223_v33  ;;  %3176 = vmatprep.subr.bf16.mxu0 %v3175_v30  ;;  %v1179_v33 = vld [vmem:[#allocation7 + $0x430] sm:$0xff]  ;;  %v3221_v30 = vpack.c.bf16 %v1214_v23, %v1213_v22  ;;  %v3237_v22 = vpack.c.bf16 %v1238_v1, %v1237_v11  ;;  %v4249_v23 = vrot.slane %v1493_v8, %v4193_v15  ;;  %v1261_v50 = vld [vmem:[#allocation7 + $0x6c0] sm:$0xff]  ;;  %v1246_v8 = vld [vmem:[#allocation7 + $0x648] sm:$0xff] }
 0x63a   :  { %3206 = vmatpush3.bf16.msra.mxu1 %v3205_v32  ;;  %1982 = vmatprep.mubr.f32.mxu1 %v1492_v16  ;;  %v3185_v9 = vpack.c.bf16 %v1180_v58, %v1179_v33  ;;  %v1215_v32 = vld [vmem:[#allocation7 + $0x550] sm:$0xff]  ;;  %v1185_v16 = vld [vmem:[#allocation7 + $0x460] sm:$0xff]  ;;  %v1254_v33 = vld [vmem:[#allocation7 + $0x688] sm:$0xff]  ;;  %v1508_v29 = vcombine.high %v4246_v17, %v4246_v17 }
 0x63b   :  { %3208 = vmatprep.subr.bf16.mxu1 %v3207_v35  ;;  %v1233_v35 = vld [vmem:[#allocation7 + $0x5e0] sm:$0xff]  ;;  %v3225_v38 = vpack.c.bf16 %v1216_v61, %v1215_v32  ;;  %v1271_v32 = vld [vmem:[#allocation7 + $0x710] sm:$0xff]  ;;  %v1272_v61 = vld [vmem:[#allocation7 + $0x718] sm:$0xff] }
 0x63c   :  { %3178 = vmatpush3.bf16.msra.mxu0 %v3177_v6  ;;  %v1186_v6 = vld [vmem:[#allocation7 + $0x468] sm:$0xff]  ;;  %v3227_v42 = vpack.c.bf16 %v1234_v36, %v1233_v35  ;;  %v1289_v36 = vld [vmem:[#allocation7 + $0x7a0] sm:$0xff]  ;;  %v1263_v11 = vld [vmem:[#allocation7 + $0x6d0] sm:$0xff] }
 0x63d   :  { %3180 = vmatprep.subr.bf16.mxu0 %v3179_v41  ;;  %v1204_v41 = vld [vmem:[#allocation7 + $0x4f8] sm:$0xff]  ;;  %v3197_v45 = vpack.c.bf16 %v1186_v6, %v1185_v16  ;;  %v3243_v16 = vpack.c.bf16 %v1258_v34, %v1257_v26  ;;  %v1241_v6 = vld [vmem:[#allocation7 + $0x620] sm:$0xff] }
 0x63e   :  { %3210 = vmatpush3.bf16.msra.mxu1 %v3209_v40  ;;  %v1218_v40 = vld [vmem:[#allocation7 + $0x568] sm:$0xff]  ;;  %v3199_v46 = vpack.c.bf16 %v1204_v41, %v1203_v39  ;;  %v1259_v39 = vld [vmem:[#allocation7 + $0x6b0] sm:$0xff]  ;;  %v1260_v41 = vld [vmem:[#allocation7 + $0x6b8] sm:$0xff] }
 0x63f   :  { %3212 = vmatprep.subr.bf16.mxu1 %v3211_v57  ;;  %v1236_v57 = vld [vmem:[#allocation7 + $0x5f8] sm:$0xff]  ;;  %v3229_v52 = vpack.c.bf16 %v1218_v40, %v1217_v43  ;;  %v1273_v43 = vld [vmem:[#allocation7 + $0x720] sm:$0xff]  ;;  %v1274_v40 = vld [vmem:[#allocation7 + $0x728] sm:$0xff] }
 0x640   :  { %3182 = vmatpush3.bf16.msra.mxu0 %v3181_v49  ;;  %v1188_v49 = vld [vmem:[#allocation7 + $0x478] sm:$0xff]  ;;  %v3231_v58 = vpack.c.bf16 %v1236_v57, %v1235_v13  ;;  %v1291_v13 = vld [vmem:[#allocation7 + $0x7b0] sm:$0xff] }
 0x641   :  { %3184 = vmatprep.subr.bf16.mxu0 %v3183_v54  ;;  %v1253_v54 = vld [vmem:[#allocation7 + $0x680] sm:$0xff]  ;;  %v3201_v3 = vpack.c.bf16 %v1188_v49, %v1187_v47  ;;  %v1292_v57 = vld [vmem:[#allocation7 + $0x7b8] sm:$0xff]  ;;  %v3277_v49 = vpack.c.bf16 %v1274_v40, %v1273_v43  ;;  %v1251_v40 = vld [vmem:[#allocation7 + $0x670] sm:$0xff] }
 0x642   :  { %3214 = vmatpush3.bf16.msra.mxu1 %v3213_v60  ;;  %v1219_v60 = vld [vmem:[#allocation7 + $0x570] sm:$0xff]  ;;  %v1244_v47 = vld [vmem:[#allocation7 + $0x638] sm:$0xff] }
 0x643   :  { %3216 = vmatprep.subr.bf16.mxu1 %v3215_v4  ;;  %v1285_v4 = vld [vmem:[#allocation7 + $0x780] sm:$0xff]  ;;  %v1264_v1 = vld [vmem:[#allocation7 + $0x6d8] sm:$0xff] }
 0x644   :  { %3186 = vmatpush3.bf16.msra.mxu0 %v3185_v9  ;;  %v3235_v9 = vpack.c.bf16 %v1254_v33, %v1253_v54  ;;  %v3267_v53 = vpack.c.bf16 %v1286_v5, %v1285_v4  ;;  %v3279_v54 = vpack.c.bf16 %v1292_v57, %v1291_v13  ;;  %v1275_v33 = vld [vmem:[#allocation7 + $0x730] sm:$0xff]  ;;  %v1245_v5 = vld [vmem:[#allocation7 + $0x640] sm:$0xff]  ;;  %v1280_v26 = vld [vmem:[#allocation7 + $0x758] sm:$0xff] }
 0x645   :  { %3188 = vmatprep.subr.bf16.mxu0 %v3187_v2  ;;  %v3233_v2 = vpack.c.bf16 %v1220_v0, %v1219_v60  ;;  %v1293_v0 = vld [vmem:[#allocation7 + $0x7c0] sm:$0xff] }
 0x646   :  { %3218 = vmatpush3.bf16.msra.mxu1 %v3217_v55  ;;  %v1256_v55 = vld [vmem:[#allocation7 + $0x698] sm:$0xff]  ;;  %v1317_v57 = vld [vmem:[#allocation7 + $0x880] sm:$0xff] }
 0x647   :  { %3220 = vmatprep.subr.bf16.mxu1 %v3219_v20  ;;  %v1270_v20 = vld [vmem:[#allocation7 + $0x708] sm:$0xff]  ;;  %v3239_v56 = vpack.c.bf16 %v1256_v55, %v1255_v18  ;;  %v1277_v18 = vld [vmem:[#allocation7 + $0x740] sm:$0xff] }
 0x648   :  { %3190 = vmatpush3.bf16.msra.mxu0 %v3189_v10  ;;  %v1287_v10 = vld [vmem:[#allocation7 + $0x790] sm:$0xff]  ;;  %v1278_v55 = vld [vmem:[#allocation7 + $0x748] sm:$0xff] }
 0x649   :  { %3192 = vmatprep.subr.bf16.mxu0 %v3191_v24  ;;  %v1239_v24 = vld [vmem:[#allocation7 + $0x610] sm:$0xff] }
 0x64a   :  { %3222 = vmatpush3.bf16.msra.mxu1 %v3221_v30  ;;  %v3269_v30 = vpack.c.bf16 %v1270_v20, %v1269_v19  ;;  %v3241_v35 = vpack.c.bf16 %v1240_v28, %v1239_v24  ;;  %v1295_v19 = vld [vmem:[#allocation7 + $0x7d0] sm:$0xff]  ;;  %v1296_v20 = vld [vmem:[#allocation7 + $0x7d8] sm:$0xff]  ;;  %v1265_v24 = vld [vmem:[#allocation7 + $0x6e0] sm:$0xff] }
 0x64b   :  { %3224 = vmatprep.subr.bf16.mxu1 %v3223_v31  ;;  %v3271_v31 = vpack.c.bf16 %v1288_v27, %v1287_v10  ;;  %v1247_v10 = vld [vmem:[#allocation7 + $0x650] sm:$0xff]  ;;  %v1248_v27 = vld [vmem:[#allocation7 + $0x658] sm:$0xff]  ;;  %v1266_v28 = vld [vmem:[#allocation7 + $0x6e8] sm:$0xff] }
 0x64c   :  { %3194 = vmatpush3.bf16.msra.mxu0 %v3193_v63  ;;  %v1509_v63 = vcombine.high %v4249_v23, %v4249_v23  ;;  %v3257_v34 = vpack.c.bf16 %v1248_v27, %v1247_v10  ;;  %v1335_v27 = vld [vmem:[#allocation7 + $0x910] sm:$0xff] }
 0x64d   :  { %3196 = vmatprep.subr.bf16.mxu0 %v3195_v37  ;;  %v1290_v37 = vld [vmem:[#allocation7 + $0x7a8] sm:$0xff] }
 0x64e   :  { %3226 = vmatpush3.bf16.msra.mxu1 %v3225_v38  ;;  %v1242_v38 = vld [vmem:[#allocation7 + $0x628] sm:$0xff] }
 0x64f   :  { %3228 = vmatprep.subr.bf16.mxu1 %v3227_v42  ;;  %v3275_v42 = vpack.c.bf16 %v1290_v37, %v1289_v36  ;;  %v1267_v37 = vld [vmem:[#allocation7 + $0x6f0] sm:$0xff] }
 0x650   :  { %3198 = vmatpush3.bf16.msra.mxu0 %v3197_v45  ;;  %v3245_v45 = vpack.c.bf16 %v1242_v38, %v1241_v6  ;;  %v1281_v38 = vld [vmem:[#allocation7 + $0x760] sm:$0xff] }
 0x651   :  { %3200 = vmatprep.subr.bf16.mxu0 %v3199_v46  ;;  %v3247_v46 = vpack.c.bf16 %v1260_v41, %v1259_v39  ;;  %v1299_v41 = vld [vmem:[#allocation7 + $0x7f0] sm:$0xff] }
 0x652   :  { %3230 = vmatpush3.bf16.msra.mxu1 %v3229_v52  ;;  %v1262_v52 = vld [vmem:[#allocation7 + $0x6c8] sm:$0xff] }
 0x653   :  { %3232 = vmatprep.subr.bf16.mxu1 %v3231_v58  ;;  %v1276_v58 = vld [vmem:[#allocation7 + $0x738] sm:$0xff]  ;;  %v3251_v4 = vpack.c.bf16 %v1262_v52, %v1261_v50  ;;  %v1349_v52 = vld [vmem:[#allocation7 + $0x980] sm:$0xff] }
 0x654   :  { %3202 = vmatpush3.bf16.msra.mxu0 %v3201_v3  ;;  %v1294_v3 = vld [vmem:[#allocation7 + $0x7c8] sm:$0xff] }
 0x655   :  { %3236 = vmatprep.subr.bf16.mxu0 %v3235_v9  ;;  %v3281_v9 = vpack.c.bf16 %v1276_v58, %v1275_v33  ;;  %v1301_v58 = vld [vmem:[#allocation7 + $0x800] sm:$0xff] }
 0x656   :  { %3234 = vmatpush3.bf16.msra.mxu1 %v3233_v2  ;;  %v3283_v2 = vpack.c.bf16 %v1294_v3, %v1293_v0  ;;  %v1319_v3 = vld [vmem:[#allocation7 + $0x890] sm:$0xff] }
 0x657   :  { %1913 = vmatmul.mubr.f32.vlgmr.msra.gmra.mrb[4].mxu0 %v4234_v21  ;;  %3268 = vmatprep.subr.bf16.mxu1 %v3267_v53  ;;  %v3273_v21 = vpack.c.bf16 %v1272_v61, %v1271_v32  ;;  %v3253_v53 = vpack.c.bf16 %v1246_v8, %v1245_v5  ;;  %v1298_v32 = vld [vmem:[#allocation7 + $0x7e8] sm:$0xff]  ;;  %v3259_v61 = vpack.c.bf16 %v1266_v28, %v1265_v24  ;;  %v1333_v8 = vld [vmem:[#allocation7 + $0x900] sm:$0xff] }
 0x658   :  { %3238 = vmatpush3.bf16.msra.mxu0 %v3237_v22  ;;  %2052 = vmatprep.mubr.f32.mxu0 %v1508_v29  ;;  %v3255_v22 = vpack.c.bf16 %v1264_v1, %v1263_v11  ;;  %v3287_v29 = vpack.c.bf16 %v1296_v20, %v1295_v19  ;;  %v1351_v1 = vld [vmem:[#allocation7 + $0x990] sm:$0xff]  ;;  %v1321_v20 = vld [vmem:[#allocation7 + $0x8a0] sm:$0xff] }
 0x659   :  { %1983 = vmatmul.mubr.f32.vlgmr.msra.gmra.mrb[16].mxu1 %v4237_v25  ;;  %3240 = vmatprep.subr.bf16.mxu0 %v3239_v56  ;;  %v1243_v25 = vld [vmem:[#allocation7 + $0x630] sm:$0xff]  ;;  %v3285_v56 = vpack.c.bf16 %v1278_v55, %v1277_v18  ;;  %v1353_v28 = vld [vmem:[#allocation7 + $0x9a0] sm:$0xff] }
 0x65a   :  { %3270 = vmatpush3.bf16.msra.mxu1 %v3269_v30  ;;  %2122 = vmatprep.mubr.f32.mxu1 %v1509_v63  ;;  %v3249_v60 = vpack.c.bf16 %v1244_v47, %v1243_v25  ;;  %v1279_v30 = vld [vmem:[#allocation7 + $0x750] sm:$0xff]  ;;  %v1249_v63 = vld [vmem:[#allocation7 + $0x660] sm:$0xff] }
 0x65b   :  { %3272 = vmatprep.subr.bf16.mxu1 %v3271_v31  ;;  %v1297_v31 = vld [vmem:[#allocation7 + $0x7e0] sm:$0xff]  ;;  %v3289_v36 = vpack.c.bf16 %v1280_v26, %v1279_v30  ;;  %v1283_v47 = vld [vmem:[#allocation7 + $0x770] sm:$0xff] }
 0x65c   :  { %3242 = vmatpush3.bf16.msra.mxu0 %v3241_v35  ;;  %v1250_v35 = vld [vmem:[#allocation7 + $0x668] sm:$0xff]  ;;  %v3291_v6 = vpack.c.bf16 %v1298_v32, %v1297_v31  ;;  %v1303_v55 = vld [vmem:[#allocation7 + $0x810] sm:$0xff]  ;;  %v1305_v26 = vld [vmem:[#allocation7 + $0x820] sm:$0xff] }
 0x65d   :  { %3244 = vmatprep.subr.bf16.mxu0 %v3243_v16  ;;  %v1268_v16 = vld [vmem:[#allocation7 + $0x6f8] sm:$0xff]  ;;  %v3261_v39 = vpack.c.bf16 %v1250_v35, %v1249_v63  ;;  %v1323_v32 = vld [vmem:[#allocation7 + $0x8b0] sm:$0xff]  ;;  %v1337_v63 = vld [vmem:[#allocation7 + $0x920] sm:$0xff] }
 0x65e   :  { %3274 = vmatpush3.bf16.msra.mxu1 %v3273_v21  ;;  %v1282_v21 = vld [vmem:[#allocation7 + $0x768] sm:$0xff]  ;;  %v3263_v43 = vpack.c.bf16 %v1268_v16, %v1267_v37  ;;  %v1355_v37 = vld [vmem:[#allocation7 + $0x9b0] sm:$0xff]  ;;  %v1356_v16 = vld [vmem:[#allocation7 + $0x9b8] sm:$0xff] }
 0x65f   :  { %3276 = vmatprep.subr.bf16.mxu1 %v3275_v42  ;;  %v1300_v42 = vld [vmem:[#allocation7 + $0x7f8] sm:$0xff]  ;;  %v3293_v13 = vpack.c.bf16 %v1282_v21, %v1281_v38  ;;  %v1338_v35 = vld [vmem:[#allocation7 + $0x928] sm:$0xff]  ;;  %v1307_v38 = vld [vmem:[#allocation7 + $0x830] sm:$0xff] }
 0x660   :  { %3246 = vmatpush3.bf16.msra.mxu0 %v3245_v45  ;;  %v1252_v45 = vld [vmem:[#allocation7 + $0x678] sm:$0xff]  ;;  %v3295_v25 = vpack.c.bf16 %v1300_v42, %v1299_v41  ;;  %v3341_v21 = vpack.c.bf16 %v1338_v35, %v1337_v63  ;;  %v1326_v41 = vld [vmem:[#allocation7 + $0x8c8] sm:$0xff]  ;;  %v3343_v42 = vpack.c.bf16 %v1356_v16, %v1355_v37  ;;  %v1345_v35 = vld [vmem:[#allocation7 + $0x960] sm:$0xff] }
 0x661   :  { %3248 = vmatprep.subr.bf16.mxu0 %v3247_v46  ;;  %v1318_v46 = vld [vmem:[#allocation7 + $0x888] sm:$0xff]  ;;  %v3265_v50 = vpack.c.bf16 %v1252_v45, %v1251_v40  ;;  %v1340_v40 = vld [vmem:[#allocation7 + $0x938] sm:$0xff] }
 0x662   :  { %3278 = vmatpush3.bf16.msra.mxu1 %v3277_v49  ;;  %v1284_v49 = vld [vmem:[#allocation7 + $0x778] sm:$0xff]  ;;  %v3299_v33 = vpack.c.bf16 %v1318_v46, %v1317_v57  ;;  %v1358_v57 = vld [vmem:[#allocation7 + $0x9c8] sm:$0xff] }
 0x663   :  { %3280 = vmatprep.subr.bf16.mxu1 %v3279_v54  ;;  %v1350_v54 = vld [vmem:[#allocation7 + $0x988] sm:$0xff]  ;;  %v3297_v0 = vpack.c.bf16 %v1284_v49, %v1283_v47  ;;  %v1309_v47 = vld [vmem:[#allocation7 + $0x840] sm:$0xff] }
 0x664   :  { %3250 = vmatpush3.bf16.msra.mxu0 %v3249_v60  ;;  %v1302_v60 = vld [vmem:[#allocation7 + $0x808] sm:$0xff]  ;;  %v3331_v5 = vpack.c.bf16 %v1350_v54, %v1349_v52  ;;  %v1327_v52 = vld [vmem:[#allocation7 + $0x8d0] sm:$0xff]  ;;  %v1328_v54 = vld [vmem:[#allocation7 + $0x8d8] sm:$0xff] }
 0x665   :  { %3252 = vmatprep.subr.bf16.mxu0 %v3251_v4  ;;  %v1320_v4 = vld [vmem:[#allocation7 + $0x898] sm:$0xff]  ;;  %v3301_v11 = vpack.c.bf16 %v1302_v60, %v1301_v58  ;;  %v1310_v49 = vld [vmem:[#allocation7 + $0x848] sm:$0xff]  ;;  %v1341_v58 = vld [vmem:[#allocation7 + $0x940] sm:$0xff] }
 0x666   :  { %3282 = vmatpush3.bf16.msra.mxu1 %v3281_v9  ;;  %v1334_v9 = vld [vmem:[#allocation7 + $0x908] sm:$0xff]  ;;  %v3303_v18 = vpack.c.bf16 %v1320_v4, %v1319_v3  ;;  %v1359_v3 = vld [vmem:[#allocation7 + $0x9d0] sm:$0xff]  ;;  %v1360_v4 = vld [vmem:[#allocation7 + $0x9d8] sm:$0xff] }
 0x667   :  { %3284 = vmatprep.subr.bf16.mxu1 %v3283_v2  ;;  %v1352_v2 = vld [vmem:[#allocation7 + $0x998] sm:$0xff]  ;;  %v3333_v19 = vpack.c.bf16 %v1334_v9, %v1333_v8  ;;  %v1342_v60 = vld [vmem:[#allocation7 + $0x948] sm:$0xff]  ;;  %v3319_v9 = vpack.c.bf16 %v1328_v54, %v1327_v52  ;;  %v1347_v52 = vld [vmem:[#allocation7 + $0x970] sm:$0xff] }
 0x668   :  { %3254 = vmatpush3.bf16.msra.mxu0 %v3253_v53  ;;  %v1304_v53 = vld [vmem:[#allocation7 + $0x818] sm:$0xff]  ;;  %v3335_v10 = vpack.c.bf16 %v1352_v2, %v1351_v1  ;;  %v1413_v54 = vld [vmem:[#allocation7 + $0xb80] sm:$0xff] }
 0x669   :  { %3256 = vmatprep.subr.bf16.mxu0 %v3255_v22  ;;  %v1322_v22 = vld [vmem:[#allocation7 + $0x8a8] sm:$0xff]  ;;  %v3305_v24 = vpack.c.bf16 %v1304_v53, %v1303_v55  ;;  %v1312_v1 = vld [vmem:[#allocation7 + $0x858] sm:$0xff]  ;;  %v3349_v55 = vpack.c.bf16 %v1342_v60, %v1341_v58  ;;  %v1329_v53 = vld [vmem:[#allocation7 + $0x8e0] sm:$0xff] }
 0x66a   :  { %3286 = vmatpush3.bf16.msra.mxu1 %v3285_v56  ;;  %v1336_v56 = vld [vmem:[#allocation7 + $0x918] sm:$0xff]  ;;  %v3307_v30 = vpack.c.bf16 %v1322_v22, %v1321_v20 }
 0x66b   :  { %3288 = vmatprep.subr.bf16.mxu1 %v3287_v29  ;;  %v1354_v29 = vld [vmem:[#allocation7 + $0x9a8] sm:$0xff]  ;;  %v3337_v31 = vpack.c.bf16 %v1336_v56, %v1335_v27  ;;  %v1343_v27 = vld [vmem:[#allocation7 + $0x950] sm:$0xff]  ;;  %v1344_v56 = vld [vmem:[#allocation7 + $0x958] sm:$0xff] }
 0x66c   :  { %3258 = vmatpush3.bf16.msra.mxu0 %v3257_v34  ;;  %v1306_v34 = vld [vmem:[#allocation7 + $0x828] sm:$0xff] }
 0x66d   :  { %3260 = vmatprep.subr.bf16.mxu0 %v3259_v61  ;;  %v1324_v61 = vld [vmem:[#allocation7 + $0x8b8] sm:$0xff] }
 0x66e   :  { %3290 = vmatpush3.bf16.msra.mxu1 %v3289_v36  ;;  %v3309_v36 = vpack.c.bf16 %v1306_v34, %v1305_v26 }
 0x66f   :  { %3292 = vmatprep.subr.bf16.mxu1 %v3291_v6  ;;  %v3311_v6 = vpack.c.bf16 %v1324_v61, %v1323_v32  ;;  %v1331_v32 = vld [vmem:[#allocation7 + $0x8f0] sm:$0xff]  ;;  %v1332_v61 = vld [vmem:[#allocation7 + $0x8f8] sm:$0xff] }
 0x670   :  { %3262 = vmatpush3.bf16.msra.mxu0 %v3261_v39  ;;  %v1325_v39 = vld [vmem:[#allocation7 + $0x8c0] sm:$0xff] }
 0x671   :  { %3264 = vmatprep.subr.bf16.mxu0 %v3263_v43  ;;  %v1339_v43 = vld [vmem:[#allocation7 + $0x930] sm:$0xff] }
 0x672   :  { %3294 = vmatpush3.bf16.msra.mxu1 %v3293_v13  ;;  %v1357_v13 = vld [vmem:[#allocation7 + $0x9c0] sm:$0xff] }
 0x673   :  { %3296 = vmatprep.subr.bf16.mxu1 %v3295_v25  ;;  %v3315_v25 = vpack.c.bf16 %v1326_v41, %v1325_v39 }
 0x674   :  { %3266 = vmatpush3.bf16.msra.mxu0 %v3265_v50  ;;  %v3345_v50 = vpack.c.bf16 %v1340_v40, %v1339_v43  ;;  %v1315_v40 = vld [vmem:[#allocation7 + $0x870] sm:$0xff] }
 0x675   :  { %3300 = vmatprep.subr.bf16.mxu0 %v3299_v33  ;;  %v3347_v33 = vpack.c.bf16 %v1358_v57, %v1357_v13  ;;  %v1381_v57 = vld [vmem:[#allocation7 + $0xa80] sm:$0xff] }
 0x676   :  { %3298 = vmatpush3.bf16.msra.mxu1 %v3297_v0  ;;  %v3317_v0 = vpack.c.bf16 %v1310_v49, %v1309_v47 }
 0x677   :  { %2053 = vmatmul.mubr.f32.vlgmr.msra.gmra.mrb[6].mxu0 %v4246_v17  ;;  %3332 = vmatprep.subr.bf16.mxu1 %v3331_v5  ;;  %v3339_v17 = vpack.c.bf16 %v1354_v29, %v1353_v28  ;;  %v1313_v28 = vld [vmem:[#allocation7 + $0x860] sm:$0xff] }
 0x678   :  { %3302 = vmatpush3.bf16.msra.mxu0 %v3301_v11  ;;  %v1311_v11 = vld [vmem:[#allocation7 + $0x850] sm:$0xff]  ;;  %v1361_v29 = vld [vmem:[#allocation7 + $0x9e0] sm:$0xff] }
 0x679   :  { %2123 = vmatmul.mubr.f32.vlgmr.msra.gmra.mrb[18].mxu1 %v4249_v23  ;;  %3304 = vmatprep.subr.bf16.mxu0 %v3303_v18  ;;  %v1308_v23 = vld [vmem:[#allocation7 + $0x838] sm:$0xff] }
 0x67a   :  { %3334 = vmatpush3.bf16.msra.mxu1 %v3333_v19  ;;  %v3313_v45 = vpack.c.bf16 %v1308_v23, %v1307_v38  ;;  %v1330_v19 = vld [vmem:[#allocation7 + $0x8e8] sm:$0xff]  ;;  %v3327_v38 = vpack.c.bf16 %v1332_v61, %v1331_v32  ;;  %v1363_v23 = vld [vmem:[#allocation7 + $0x9f0] sm:$0xff]  ;;  %v1368_v32 = vld [vmem:[#allocation7 + $0xa18] sm:$0xff] }
 0x67b   :  { %3336 = vmatprep.subr.bf16.mxu1 %v3335_v10  ;;  %v3351_v10 = vpack.c.bf16 %v1360_v4, %v1359_v3  ;;  %v3323_v34 = vpack.c.bf16 %v1330_v19, %v1329_v53  ;;  %v1397_v19 = vld [vmem:[#allocation7 + $0xb00] sm:$0xff] }
 0x67c   :  { %3306 = vmatpush3.bf16.msra.mxu0 %v3305_v24  ;;  %v3321_v24 = vpack.c.bf16 %v1312_v1, %v1311_v11 }
 0x67d   :  { %3308 = vmatprep.subr.bf16.mxu0 %v3307_v30  ;;  %v1362_v30 = vld [vmem:[#allocation7 + $0x9e8] sm:$0xff] }
 0x67e   :  { %3338 = vmatpush3.bf16.msra.mxu1 %v3337_v31  ;;  %v1314_v31 = vld [vmem:[#allocation7 + $0x868] sm:$0xff]  ;;  %v3355_v63 = vpack.c.bf16 %v1362_v30, %v1361_v29  ;;  %v1415_v30 = vld [vmem:[#allocation7 + $0xb90] sm:$0xff] }
 0x67f   :  { %3340 = vmatprep.subr.bf16.mxu1 %v3339_v17  ;;  %v3353_v17 = vpack.c.bf16 %v1344_v56, %v1343_v27  ;;  %v1383_v27 = vld [vmem:[#allocation7 + $0xa90] sm:$0xff]  ;;  %v1384_v56 = vld [vmem:[#allocation7 + $0xa98] sm:$0xff] }
 0x680   :  { %3310 = vmatpush3.bf16.msra.mxu0 %v3309_v36  ;;  %v1346_v36 = vld [vmem:[#allocation7 + $0x968] sm:$0xff] }
 0x681   :  { %v777_v46 = vpop.permute.xlu0 %776  ;;  %3312 = vmatprep.subr.bf16.mxu0 %v3311_v6  ;;  %v3325_v6 = vpack.c.bf16 %v1314_v31, %v1313_v28  ;;  %v3357_v13 = vpack.c.bf16 %v1346_v36, %v1345_v35  ;;  %v1367_v31 = vld [vmem:[#allocation7 + $0xa10] sm:$0xff]  ;;  %v1386_v35 = vld [vmem:[#allocation7 + $0xaa8] sm:$0xff] }
 0x682   :  { %3342 = vmatpush3.bf16.msra.mxu1 %v3341_v21  ;;  %v1364_v21 = vld [vmem:[#allocation7 + $0x9f8] sm:$0xff] }
 0x683   :  { %3344 = vmatprep.subr.bf16.mxu1 %v3343_v42 }
 0x684   :  { %3314 = vmatpush3.bf16.msra.mxu0 %v3313_v45  ;;  %v1316_v45 = vld [vmem:[#allocation7 + $0x878] sm:$0xff] }
 0x685   :  { %v785_v5 = vpop.permute.xlu0 %784  ;;  %v781_v8 = vpop.permute.xlu1 %780  ;;  %3316 = vmatprep.subr.bf16.mxu0 %v3315_v25  ;;  %v1382_v25 = vld [vmem:[#allocation7 + $0xa88] sm:$0xff] }
 0x686   :  { %v793_v2 = vsel %vm113_vm0, %v781_v8, %v785_v5  ;;  %v795_v18 = vsel %vm113_vm0, %v777_v46, %v781_v8  ;;  %3346 = vmatpush3.bf16.msra.mxu1 %v3345_v50  ;;  %v3359_v50 = vpack.c.bf16 %v1364_v21, %v1363_v23  ;;  %v1417_v23 = vld [vmem:[#allocation7 + $0xba0] sm:$0xff]  ;;  %v1418_v21 = vld [vmem:[#allocation7 + $0xba8] sm:$0xff] }
 0x687   :  { %v802_v20 = vmax.f32 %v4190_v48, %v795_v18  ;;  %v803_v22 = vmax.f32 %v4203_v44, %v793_v2  ;;  %3348 = vmatprep.subr.bf16.mxu1 %v3347_v33  ;;  %v1414_v33 = vld [vmem:[#allocation7 + $0xb88] sm:$0xff]  ;;  %v1365_v2 = vld [vmem:[#allocation7 + $0xa00] sm:$0xff] }
 0x688   :  { %3318 = vmatpush3.bf16.msra.mxu0 %v3317_v0  ;;  %v3363_v0 = vpack.c.bf16 %v1382_v25, %v1381_v57  ;;  %v3395_v8 = vpack.c.bf16 %v1414_v33, %v1413_v54  ;;  %v1366_v18 = vld [vmem:[#allocation7 + $0xa08] sm:$0xff] }
 0x689   :  { %v887_v26 = vcombine.low %v802_v20, %v803_v22  ;;  %3320 = vmatprep.subr.bf16.mxu0 %v3319_v9  ;;  %v789_v44 = vpop.permute.xlu1 %788  ;;  %v1398_v20 = vld [vmem:[#allocation7 + $0xb08] sm:$0xff]  ;;  %v3365_v22 = vpack.c.bf16 %v1366_v18, %v1365_v2  ;;  %v1392_v2 = vld [vmem:[#allocation7 + $0xad8] sm:$0xff] }
 0x68a   :  { %3350 = vmatpush3.bf16.msra.mxu1 %v3349_v55  ;;  %v791_v37 = vsel %vm113_vm0, %v785_v5, %v789_v44  ;;  %v797_v16 = vsel %vm113_vm0, %v789_v44, %v777_v46  ;;  %v1402_v57 = vld [vmem:[#allocation7 + $0xb28] sm:$0xff]  ;;  %vm2517_vm0 = vcmp.lt.s32.totalorder %v3806_v7, 3 }
 0x68b   :  { %v894_v48 = vrot.slane %v887_v26, %v4128_v59  ;;  %3352 = vmatprep.subr.bf16.mxu1 %v3351_v10  ;;  %v804_v42 = vmax.f32 %v4207_v14, %v791_v37  ;;  %v805_v43 = vmax.f32 %v4227_v62, %v797_v16  ;;  %v1348_v14 = vld [vmem:[#allocation7 + $0x978] sm:$0xff]  ;;  %v3329_v62 = vpack.c.bf16 %v1316_v45, %v1315_v40  ;;  %v1399_v37 = vld [vmem:[#allocation7 + $0xb10] sm:$0xff]  ;;  %v1390_v54 = vld [vmem:[#allocation7 + $0xac8] sm:$0xff] }
 0x68c   :  { %3322 = vmatpush3.bf16.msra.mxu0 %v3321_v24  ;;  %v3361_v3 = vpack.c.bf16 %v1348_v14, %v1347_v52  ;;  %v1416_v26 = vld [vmem:[#allocation7 + $0xb98] sm:$0xff]  ;;  %v3403_v45 = vpack.c.bf16 %v1418_v21, %v1417_v23  ;;  %v1427_v23 = vld [vmem:[#allocation7 + $0xbf0] sm:$0xff] }
 0x68d   :  { %v901_v39 = vrot.slane %v894_v48, %v4128_v59  ;;  %v905_v41 = vcombine.high %v894_v48, %v894_v48  ;;  %3324 = vmatprep.subr.bf16.mxu0 %v3323_v34  ;;  %v1002_v49 = vcombine.low %v804_v42, %v805_v43  ;;  %v3397_v34 = vpack.c.bf16 %v1398_v20, %v1397_v19  ;;  %v1400_v16 = vld [vmem:[#allocation7 + $0xb18] sm:$0xff]  ;;  %v1387_v43 = vld [vmem:[#allocation7 + $0xab0] sm:$0xff] }
 0x68e   :  { %3354 = vmatpush3.bf16.msra.mxu1 %v3353_v17  ;;  %v3367_v48 = vpack.c.bf16 %v1384_v56, %v1383_v27  ;;  %v3399_v36 = vpack.c.bf16 %v1416_v26, %v1415_v30  ;;  %v3401_v42 = vpack.c.bf16 %v1400_v16, %v1399_v37  ;;  %v1388_v40 = vld [vmem:[#allocation7 + $0xab8] sm:$0xff]  ;;  %v1423_v19 = vld [vmem:[#allocation7 + $0xbd0] sm:$0xff]  ;;  %v1409_v16 = vld [vmem:[#allocation7 + $0xb60] sm:$0xff] }
 0x68f   :  { %904 = vst.msk [vmem:[#allocation2 + $0x20] ss:$2 sm:$0x3] %vm4140_vm13, %v901_v39  ;;  %v912_v46 = vrot.slane %v905_v41, %v4128_v59  ;;  %v916_v47 = vcombine.high %v901_v39, %v901_v39  ;;  %3356 = vmatprep.subr.bf16.mxu1 %v3355_v63  ;;  %v1009_v60 = vrot.slane %v1002_v49, %v4128_v59  ;;  %v1385_v63 = vld [vmem:[#allocation7 + $0xaa0] sm:$0xff]  ;;  %v1372_v52 = vld [vmem:[#allocation7 + $0xa38] sm:$0xff]  ;;  %v1407_v30 = vld [vmem:[#allocation7 + $0xb50] sm:$0xff] }
 0x690   :  { %3326 = vmatpush3.bf16.msra.mxu0 %v3325_v6  ;;  %v3371_v39 = vpack.c.bf16 %v1386_v35, %v1385_v63  ;;  %v1369_v41 = vld [vmem:[#allocation7 + $0xa20] sm:$0xff]  ;;  %v3375_v49 = vpack.c.bf16 %v1388_v40, %v1387_v43  ;;  %v1424_v20 = vld [vmem:[#allocation7 + $0xbd8] sm:$0xff]  ;;  %v1395_v35 = vld [vmem:[#allocation7 + $0xaf0] sm:$0xff] }
 0x691   :  { %915 = vst.msk [vmem:[#allocation2 + $0x24] ss:$2 sm:$0x3] %vm4140_vm13, %v912_v46  ;;  %919 = vst.msk [vmem:[#allocation2 + $0x28] ss:$2 sm:$0x3] %vm4140_vm13, %v916_v47  ;;  %v920_v58 = vcombine.high %v912_v46, %v912_v46  ;;  %3328 = vmatprep.subr.bf16.mxu0 %v3327_v38  ;;  %v1016_v4 = vrot.slane %v1009_v60, %v4128_v59  ;;  %v1020_v5 = vcombine.high %v1009_v60, %v1009_v60 }
 0x692   :  { %3358 = vmatpush3.bf16.msra.mxu1 %v3357_v13  ;;  %v3369_v38 = vpack.c.bf16 %v1368_v32, %v1367_v31  ;;  %v1401_v13 = vld [vmem:[#allocation7 + $0xb20] sm:$0xff]  ;;  %v1419_v46 = vld [vmem:[#allocation7 + $0xbb0] sm:$0xff]  ;;  %v1420_v47 = vld [vmem:[#allocation7 + $0xbb8] sm:$0xff] }
 0x693   :  { %923 = vst.msk [vmem:[#allocation2 + $0x2c] ss:$2 sm:$0x3] %vm4140_vm13, %v920_v58  ;;  %3360 = vmatprep.subr.bf16.mxu1 %v3359_v50  ;;  %1019 = vst.msk [vmem:[#allocation2 + $0x21] ss:$2 sm:$0x3] %vm4140_vm13, %v1016_v4  ;;  %v1027_v9 = vrot.slane %v1020_v5, %v4128_v59  ;;  %v1031_v11 = vcombine.high %v1016_v4, %v1016_v4  ;;  %v3405_v14 = vpack.c.bf16 %v1402_v57, %v1401_v13 }
 0x694   :  { %3330 = vmatpush3.bf16.msra.mxu0 %v3329_v62  ;;  %v1371_v50 = vld [vmem:[#allocation7 + $0xa30] sm:$0xff]  ;;  %v1389_v62 = vld [vmem:[#allocation7 + $0xac0] sm:$0xff]  ;;  %v3407_v33 = vpack.c.bf16 %v1420_v47, %v1419_v46  ;;  %v1404_v60 = vld [vmem:[#allocation7 + $0xb38] sm:$0xff] }
 0x695   :  { %3364 = vmatprep.subr.bf16.mxu0 %v3363_v0  ;;  %1030 = vst.msk [vmem:[#allocation2 + $0x25] ss:$2 sm:$0x3] %vm4140_vm13, %v1027_v9  ;;  %1034 = vst.msk [vmem:[#allocation2 + $0x29] ss:$2 sm:$0x3] %vm4140_vm13, %v1031_v11  ;;  %v1035_v1 = vcombine.high %v1027_v9, %v1027_v9  ;;  %v3377_v0 = vpack.c.bf16 %v1372_v52, %v1371_v50  ;;  %v3379_v5 = vpack.c.bf16 %v1390_v54, %v1389_v62 }
 0x696   :  { %3362 = vmatpush3.bf16.msra.mxu1 %v3361_v3  ;;  %v1403_v58 = vld [vmem:[#allocation7 + $0xb30] sm:$0xff]  ;;  %v1421_v3 = vld [vmem:[#allocation7 + $0xbc0] sm:$0xff]  ;;  %v1422_v4 = vld [vmem:[#allocation7 + $0xbc8] sm:$0xff] }
 0x697   :  { %3396 = vmatprep.subr.bf16.mxu1 %v3395_v8  ;;  %1038 = vst.msk [vmem:[#allocation2 + $0x2d] ss:$2 sm:$0x3] %vm4140_vm13, %v1035_v1  ;;  %v1373_v8 = vld [vmem:[#allocation7 + $0xa40] sm:$0xff]  ;;  %v1374_v9 = vld [vmem:[#allocation7 + $0xa48] sm:$0xff]  ;;  %v3409_v11 = vpack.c.bf16 %v1404_v60, %v1403_v58  ;;  %v1391_v1 = vld [vmem:[#allocation7 + $0xad0] sm:$0xff]  ;;  %v3411_v18 = vpack.c.bf16 %v1422_v4, %v1421_v3 }
 0x698   :  { %v1376_v27 = vld [vmem:[#allocation7 + $0xa58] sm:$0xff]  ;;  %v1425_v31 = vld [vmem:[#allocation7 + $0xbe0] sm:$0xff]  ;;  %v1426_v32 = vld [vmem:[#allocation7 + $0xbe8] sm:$0xff] }
 0x699   :  { %v1408_v26 = vld [vmem:[#allocation7 + $0xb58] sm:$0xff]  ;;  %v3419_v37 = vpack.c.bf16 %v1426_v32, %v1425_v31  ;;  %v1411_v40 = vld [vmem:[#allocation7 + $0xb70] sm:$0xff]  ;;  %v2541_v46 = vld [vmem:[#allocation8] ss:$0 sm:$0xff] }
 0x69a   :  { %v3417_v63 = vpack.c.bf16 %v1408_v26, %v1407_v30  ;;  %v1428_v21 = vld [vmem:[#allocation7 + $0xbf8] sm:$0xff]  ;;  %v2410_v58 = vld [vmem:[%s4368_s7 + $0x8] sm:$0xff]  ;;  %v2423_v31 = vld [vmem:[%s4368_s7 + $0x70] sm:$0xff] }
 0x69b   :  { %v3423_v43 = vpack.c.bf16 %v1428_v21, %v1427_v23  ;;  %v2413_v4 = vld [vmem:[%s4368_s7 + $0x20] sm:$0xff]  ;;  %v2422_v26 = vld [vmem:[%s4368_s7 + $0x68] sm:$0xff]  ;;  %v2424_v32 = vld [vmem:[%s4368_s7 + $0x78] sm:$0xff] }
 0x69c   :  { %v1043_v55 = vld [vmem:[#allocation2 + $0x20] sm:$0xff] }
 0x69d   :  { %v1517_v53 = vrot.slane %v1043_v55, %v4193_v15  ;;  %v1510_v59 = vcombine.high %v1043_v55, %v1043_v55  ;;  %v1405_v55 = vld [vmem:[#allocation7 + $0xb40] sm:$0xff]  ;;  %v2421_v30 = vld [vmem:[%s4368_s7 + $0x60] sm:$0xff] }
 0x69e   :  { %v1044_v10 = vld [vmem:[#allocation2 + $0x28] sm:$0xff] }
 0x69f   :  { %v1525_v24 = vcombine.high %v1517_v53, %v1517_v53  ;;  %v1524_v28 = vrot.slane %v1510_v59, %v4193_v15  ;;  %v4296_v29 = vrot.slane %v1044_v10, %v4193_v15  ;;  %v1527_v12 = vcombine.high %v1044_v10, %v1044_v10  ;;  %v1375_v10 = vld [vmem:[#allocation7 + $0xa50] sm:$0xff] }
 0x6a0   :  { %v3381_v59 = vpack.c.bf16 %v1374_v9, %v1373_v8  ;;  %v2415_v9 = vld [vmem:[%s4368_s7 + $0x30] sm:$0xff] }
 0x6a1   :  { %2192 = vmatprep.mubr.f32.mxu0 %v1525_v24  ;;  %v1526_v61 = vcombine.high %v1524_v28, %v1524_v28  ;;  %v1542_v17 = vcombine.high %v4296_v29, %v4296_v29  ;;  %v4301_v44 = vrot.slane %v1527_v12, %v4193_v15  ;;  %v1370_v15 = vld [vmem:[#allocation7 + $0xa28] sm:$0xff]  ;;  %v1393_v24 = vld [vmem:[#allocation7 + $0xae0] sm:$0xff]  ;;  %v3415_v12 = vpack.c.bf16 %v1424_v20, %v1423_v19 }
 0x6a2   :  { %2193 = vmatmul.mubr.f32.vlgmr.msra.gmra.mrb[8].mxu0 %v1517_v53  ;;  %v3373_v25 = vpack.c.bf16 %v1370_v15, %v1369_v41  ;;  %v1406_v53 = vld [vmem:[#allocation7 + $0xb48] sm:$0xff]  ;;  %v1379_v41 = vld [vmem:[#allocation7 + $0xa70] sm:$0xff]  ;;  %v1380_v15 = vld [vmem:[#allocation7 + $0xa78] sm:$0xff] }
 0x6a3   :  { %3366 = vmatpush3.bf16.msra.mxu0 %v3365_v22  ;;  %2262 = vmatprep.mubr.f32.mxu1 %v1526_v61  ;;  %v1543_v6 = vcombine.high %v4301_v44, %v4301_v44  ;;  %v3383_v22 = vpack.c.bf16 %v1392_v2, %v1391_v1  ;;  %v3413_v56 = vpack.c.bf16 %v1406_v53, %v1405_v55  ;;  %v2417_v2 = vld [vmem:[%s4368_s7 + $0x40] sm:$0xff] }
 0x6a4   :  { %2332 = vmatprep.mubr.f32.mxu0 %v1542_v17  ;;  %2263 = vmatmul.mubr.f32.vlgmr.msra.gmra.mrb[20].mxu1 %v1524_v28  ;;  %v1394_v28 = vld [vmem:[#allocation7 + $0xae8] sm:$0xff]  ;;  %v1377_v17 = vld [vmem:[#allocation7 + $0xa60] sm:$0xff]  ;;  %v3393_v13 = vpack.c.bf16 %v1380_v15, %v1379_v41 }
 0x6a5   :  { %3398 = vmatpush3.bf16.msra.mxu1 %v3397_v34  ;;  %3368 = vmatprep.subr.bf16.mxu0 %v3367_v48  ;;  %v3385_v34 = vpack.c.bf16 %v1376_v27, %v1375_v10  ;;  %v3387_v61 = vpack.c.bf16 %v1394_v28, %v1393_v24  ;;  %v1378_v48 = vld [vmem:[#allocation7 + $0xa68] sm:$0xff]  ;;  %v2420_v27 = vld [vmem:[%s4368_s7 + $0x58] sm:$0xff] }
 0x6a6   :  { %2402 = vmatprep.mubr.f32.mxu1 %v1543_v6  ;;  %3400 = vmatprep.subr.bf16.mxu1 %v3399_v36  ;;  %v1396_v36 = vld [vmem:[#allocation7 + $0xaf8] sm:$0xff]  ;;  %v1410_v6 = vld [vmem:[#allocation7 + $0xb68] sm:$0xff] }
 0x6a7   :  { %3370 = vmatpush3.bf16.msra.mxu0 %v3369_v38  ;;  %v3389_v38 = vpack.c.bf16 %v1378_v48, %v1377_v17  ;;  %v2419_v10 = vld [vmem:[%s4368_s7 + $0x50] sm:$0xff] }
 0x6a8   :  { %3372 = vmatprep.subr.bf16.mxu0 %v3371_v39  ;;  %v3391_v39 = vpack.c.bf16 %v1396_v36, %v1395_v35 }
 0x6a9   :  { %3402 = vmatpush3.bf16.msra.mxu1 %v3401_v42  ;;  %v3421_v42 = vpack.c.bf16 %v1410_v6, %v1409_v16 }
 0x6aa   :  { %3404 = vmatprep.subr.bf16.mxu1 %v3403_v45  ;;  %v1412_v45 = vld [vmem:[#allocation7 + $0xb78] sm:$0xff] }
 0x6ab   :  { %3374 = vmatpush3.bf16.msra.mxu0 %v3373_v25  ;;  %v3425_v57 = vpack.c.bf16 %v1412_v45, %v1411_v40 }
 0x6ac   :  { %3376 = vmatprep.subr.bf16.mxu0 %v3375_v49 }
 0x6ad   :  { %3406 = vmatpush3.bf16.msra.mxu1 %v3405_v14 }
 0x6ae   :  { %3408 = vmatprep.subr.bf16.mxu1 %v3407_v33  ;;  %v2409_v33 = vld [vmem:[%s4368_s7] sm:$0xff] }
 0x6af   :  { %3378 = vmatpush3.bf16.msra.mxu0 %v3377_v0  ;;  %v3428_v60 = vpack.c.bf16 %v2410_v58, %v2409_v33  ;;  %v2412_v0 = vld [vmem:[%s4368_s7 + $0x18] sm:$0xff] }
 0x6b0   :  { %3380 = vmatprep.subr.bf16.mxu0 %v3379_v5  ;;  %v2414_v5 = vld [vmem:[%s4368_s7 + $0x28] sm:$0xff] }
 0x6b1   :  { %3410 = vmatpush3.bf16.msra.mxu1 %v3409_v11  ;;  %v3434_v8 = vpack.c.bf16 %v2414_v5, %v2413_v4  ;;  %v2416_v11 = vld [vmem:[%s4368_s7 + $0x38] sm:$0xff] }
 0x6b2   :  { %3412 = vmatprep.subr.bf16.mxu1 %v3411_v18  ;;  %v3437_v1 = vpack.c.bf16 %v2416_v11, %v2415_v9  ;;  %v2418_v18 = vld [vmem:[%s4368_s7 + $0x48] sm:$0xff] }
 0x6b3   :  { %3382 = vmatpush3.bf16.msra.mxu0 %v3381_v59  ;;  %v3440_v20 = vpack.c.bf16 %v2418_v18, %v2417_v2 }
 0x6b4   :  { %3384 = vmatprep.subr.bf16.mxu0 %v3383_v22 }
 0x6b5   :  { %3414 = vmatpush3.bf16.msra.mxu1 %v3413_v56 }
 0x6b6   :  { %3416 = vmatprep.subr.bf16.mxu1 %v3415_v12  ;;  %v3443_v12 = vpack.c.bf16 %v2420_v27, %v2419_v10 }
 0x6b7   :  { %3386 = vmatpush3.bf16.msra.mxu0 %v3385_v34  ;;  %v3446_v34 = vpack.c.bf16 %v2422_v26, %v2421_v30 }
 0x6b8   :  { %3388 = vmatprep.subr.bf16.mxu0 %v3387_v61  ;;  %v3449_v61 = vpack.c.bf16 %v2424_v32, %v2423_v31 }
 0x6b9   :  { %3418 = vmatpush3.bf16.msra.mxu1 %v3417_v63 }
 0x6ba   :  { %3420 = vmatprep.subr.bf16.mxu1 %v3419_v37 }
 0x6bb   :  { %3390 = vmatpush3.bf16.msra.mxu0 %v3389_v38 }
 0x6bc   :  { %3392 = vmatprep.subr.bf16.mxu0 %v3391_v39 }
 0x6bd   :  { %3422 = vmatpush3.bf16.msra.mxu1 %v3421_v42 }
 0x6be   :  { %3424 = vmatprep.subr.bf16.mxu1 %v3423_v43 }
 0x6bf   :  { %3394 = vmatpush3.bf16.msra.mxu0 %v3393_v13 }
 0x6c1   :  { %3426 = vmatpush3.bf16.msra.mxu1 %v3425_v57 }
 0x6c2   :  { %2333 = vmatmul.mubr.f32.vlgmr.msra.gmra.mrb[10].mxu0 %v4296_v29  ;;  %v2411_v29 = vld [vmem:[%s4368_s7 + $0x10] sm:$0xff] }
 0x6c3   :  { %v3431_v3 = vpack.c.bf16 %v2412_v0, %v2411_v29  ;;  %3012 = vmatprep.mubr.msk.f32.mxu0 %vm3680_vm14, %v3674_v51 }
 0x6c4   :  { %2403 = vmatmul.mubr.f32.vlgmr.msra.gmra.mrb[22].mxu1 %v4301_v44  ;;  %v3679_v44 = vmov 0.0|0.0  }
 0x6c5   :  { %3427 = vmatprep.subr.bf16.mxu0 %v3679_v44 }
 0x6c6   :  { %3429 = vmatpush3.bf16.msra.mxu0 %v3428_v60 }
 0x6c7   :  { %3430 = vmatprep.subr.bf16.mxu0 %v3679_v44 }
 0x6ca   :  { %3432 = vmatpush3.bf16.msra.mxu0 %v3431_v3 }
 0x6cb   :  { %3433 = vmatprep.subr.bf16.mxu0 %v3679_v44 }
 0x6ce   :  { %3435 = vmatpush3.bf16.msra.mxu0 %v3434_v8 }
 0x6cf   :  { %3436 = vmatprep.subr.bf16.mxu0 %v3679_v44 }
 0x6d2   :  { %3438 = vmatpush3.bf16.msra.mxu0 %v3437_v1 }
 0x6d3   :  { %3439 = vmatprep.subr.bf16.mxu0 %v3679_v44 }
 0x6d6   :  { %3441 = vmatpush3.bf16.msra.mxu0 %v3440_v20 }
 0x6d7   :  { %3442 = vmatprep.subr.bf16.mxu0 %v3679_v44 }
 0x6da   :  { %3444 = vmatpush3.bf16.msra.mxu0 %v3443_v12 }
 0x6db   :  { %3445 = vmatprep.subr.bf16.mxu0 %v3679_v44 }
 0x6de   :  { %3447 = vmatpush3.bf16.msra.mxu0 %v3446_v34 }
 0x6df   :  { %3448 = vmatprep.subr.bf16.mxu0 %v3679_v44  ;;  %v2542_v44 = vld [vmem:[#allocation10] ss:$0 sm:$0xff] }
 0x6e2   :  { %3450 = vmatpush3.bf16.msra.mxu0 %v3449_v61 }
 0x6ea   :  { %v2575_v25 = vpop.f32.mrb[0].mxu0 }
 0x6eb   :  { %v2576_v47 = vpop.f32.mrb[1].mxu0 }
 0x6ec   :  { %v2577_v49 = vadd.f32 %v2576_v47, %v2575_v25  ;;  %v2610_v50 = vpop.f32.mrb[12].mxu1 }
 0x6ed   :  { %v2611_v52 = vpop.f32.mrb[13].mxu1 }
 0x6ee   :  { %v1635_v14 = vadd.f32 %v2577_v49, %v2541_v46  ;;  %v2612_v62 = vadd.f32 %v2611_v52, %v2610_v50 }
 0x6f0   :  { %v1705_v54 = vadd.f32 %v2612_v62, %v1635_v14 }
 0x70a   :  { %v2645_v55 = vpop.f32.mrb[2].mxu0 }
 0x70b   :  { %v2646_v53 = vpop.f32.mrb[3].mxu0 }
 0x70c   :  { %v2647_v59 = vadd.f32 %v2646_v53, %v2645_v55  ;;  %v2680_v19 = vpop.f32.mrb[14].mxu1 }
 0x70d   :  { %v2681_v22 = vpop.f32.mrb[15].mxu1 }
 0x70e   :  { %v1775_v56 = vadd.f32 %v2647_v59, %v1705_v54  ;;  %v2682_v24 = vadd.f32 %v2681_v22, %v2680_v19 }
 0x710   :  { %v1845_v28 = vadd.f32 %v2682_v24, %v1775_v56 }
 0x72a   :  { %v2715_v17 = vpop.f32.mrb[4].mxu0 }
 0x72b   :  { %v2716_v48 = vpop.f32.mrb[5].mxu0 }
 0x72c   :  { %v2717_v63 = vadd.f32 %v2716_v48, %v2715_v17  ;;  %v2750_v35 = vpop.f32.mrb[16].mxu1 }
 0x72d   :  { %v2751_v36 = vpop.f32.mrb[17].mxu1 }
 0x72e   :  { %v1915_v37 = vadd.f32 %v2717_v63, %v1845_v28  ;;  %v2752_v16 = vadd.f32 %v2751_v36, %v2750_v35 }
 0x730   :  { %v1985_v6 = vadd.f32 %v2752_v16, %v1915_v37 }
 0x74a   :  { %v2785_v38 = vpop.f32.mrb[6].mxu0 }
 0x74b   :  { %v2786_v23 = vpop.f32.mrb[7].mxu0 }
 0x74c   :  { %v2787_v21 = vadd.f32 %v2786_v23, %v2785_v38  ;;  %v2820_v39 = vpop.f32.mrb[18].mxu1 }
 0x74d   :  { %v2821_v41 = vpop.f32.mrb[19].mxu1 }
 0x74e   :  { %v2055_v15 = vadd.f32 %v2787_v21, %v1985_v6  ;;  %v2822_v42 = vadd.f32 %v2821_v41, %v2820_v39 }
 0x750   :  { %v2125_v43 = vadd.f32 %v2822_v42, %v2055_v15 }
 0x775   :  { %v2855_v40 = vpop.f32.mrb[8].mxu0 }
 0x776   :  { %v2856_v45 = vpop.f32.mrb[9].mxu0 }
 0x777   :  { %v2857_v13 = vadd.f32 %v2856_v45, %v2855_v40  ;;  %v2890_v51 = vpop.f32.mrb[20].mxu1 }
 0x778   :  { %v2891_v57 = vpop.f32.mrb[21].mxu1 }
 0x779   :  { %v2195_v25 = vadd.f32 %v2857_v13, %v2125_v43  ;;  %v2892_v46 = vadd.f32 %v2891_v57, %v2890_v51 }
 0x77b   :  { %v2265_v47 = vadd.f32 %v2892_v46, %v2195_v25 }
 0x795   :  { %v2925_v49 = vpop.f32.mrb[10].mxu0 }
 0x796   :  { %v2926_v50 = vpop.f32.mrb[11].mxu0 }
 0x797   :  { %v2927_v52 = vadd.f32 %v2926_v50, %v2925_v49  ;;  %v2960_v14 = vpop.f32.mrb[22].mxu1 }
 0x798   :  { %v2961_v62 = vpop.f32.mrb[23].mxu1 }
 0x799   :  { %v2335_v54 = vadd.f32 %v2927_v52, %v2265_v47  ;;  %v2962_v33 = vadd.f32 %v2961_v62, %v2960_v14 }
 0x79b   :  { %v2405_v58 = vadd.f32 %v2962_v33, %v2335_v54 }
 0x79d   :  { %v2408_v29 = vmax.f32 %v2405_v58, 0.0 }
 0x79f   :  { %3013 = vmatmul.mubr.f32.vlgmr.msra.gmra.mrb[12].mxu0 %v2408_v29 }
 0x872   :  { %v2498_v60 = vpop.f32.mrb[12].mxu0 }
 0x873   :  { %v2499_v0 = vadd.f32 %v2542_v44, %v2498_v60  ;;  %v3014_v3 = vpop.f32.mrb[13].mxu0 }
 0x875   :  { %v2502_v4 = vsub.f32 0.0, %v2499_v0  ;;  %v2509_v5 = vand.u32 2147483647, %v2499_v0  ;;  %v2508_v59 = vmax.f32 %v2499_v0, 0.0 }
 0x877   :  { %v2510_v8 = vsub.f32 0.0, %v2509_v5  ;;  %v2503_v9 = vmul.f32 1.442695, %v2502_v4 }
 0x879   :  { %v2511_v11 = vmul.f32 1.442695, %v2510_v8 }
 0x87b   :  { %3539 = vpow2.f32 %v2511_v11 }
 0x87c   :  { %3541 = vpow2.f32 %v2503_v9 }
 0x885   :  { %v3540_v1 = vpop.eup %3539 }
 0x886   :  { %v3542_v2 = vpop.eup %3541  ;;  %v2513_v18 = vadd.f32 1.0, %v3540_v1 }
 0x887   :  { %v2505_v55 = vadd.f32 1.0, %v3542_v2 }
 0x888   :  { %3543 = vlog2.f32 %v2513_v18 }
 0x889   :  { %3545 = vrcp.f32 %v2505_v55 }
 0x892   :  { %v3544_v53 = vpop.eup %3543 }
 0x893   :  { %v2515_v19 = vmul.f32 0.6931472, %v3544_v53  ;;  %v3546_v22 = vpop.eup %3545 }
 0x895   :  { %v2516_v20 = vadd.f32 %v2515_v19, %v2508_v59 }
 0x897   :  { %v2519_v10 = vsel %vm2518_vm15, %v2516_v20, %v2499_v0 }
 0x898   :  { %v2520_v27 = vsel %vm2517_vm0, %v3546_v22, %v2519_v10 }
 0x899   :  { %2522 = vst.msk [vmem:[%s4370_s9] sm:$0x3] %vm2521_vm1, %v2520_v27 }
 0x89a   :  { %2527 = vsyncpa [#allocation4], 1 }
 0x89b   :  { %2528 = vsyncpa [#allocation6], 1 }
 0x89c   :  { %2529 = vsyncpa [#allocation9], 1 }

</bundles_post_ra>
